<compile_context>
chip_gen: v7x
topology: tpu7x:2x2x1
jax: 0.10.0
libtpu: 0.0.40
codegen_flags: <defaults>
</compile_context>

<pallas_src>
import functools

import jax
import jax.numpy as jnp
import numpy as np
from jax.experimental import pallas as pl
from jax.experimental.pallas import tpu as pltpu

EPS = 1e-5  # nn.GroupNorm default eps


# ---------------------------------------------------------------------------
# Pallas kernels
# ---------------------------------------------------------------------------
def _conv_gn_pool_kernel(p_ref, w_ref, b_ref, ga_ref, be_ref, pavg_ref,
                         feat_ref, pool_ref, *, inv_cnt):
    """One sample: conv (4 pooling-offset matmuls) + bias + GroupNorm + ReLU + 2x2 maxpool.

    p_ref    : (4, Kpad, S)   im2col patches, one block per 2x2-window offset
    w_ref    : (C, Kpad)      conv weights as a matrix (K zero-padded)
    b/ga/be  : (C, 1)         bias / GN gamma / GN beta
    pavg_ref : (C, C)         group-averaging matrix (1/cg within a group, else 0)
    feat_ref : (4, C, S)      raw conv output (pre-norm feature, offset-permuted)
    pool_ref : (C, S)         pooled GN+ReLU output
    """
    w = w_ref[...]
    b = b_ref[...]
    ys = []
    for k in range(4):                                   # static unroll, 4 MXU matmuls
        y = jnp.dot(w, p_ref[k], preferred_element_type=jnp.float32) + b
        feat_ref[k] = y
        ys.append(y)

    # GroupNorm statistics over (channels-in-group x all spatial positions) per sample,
    # via the group-averaging matmul: no reshapes, no sublane slicing.
    y_sum = ys[0] + ys[1] + ys[2] + ys[3]                                 # (C, S)
    mean_c = jnp.sum(jnp.dot(pavg_ref[...], y_sum,
                             preferred_element_type=jnp.float32),
                     axis=1, keepdims=True) * inv_cnt                     # (C, 1)
    ssq = None
    for y in ys:
        d = y - mean_c
        ssq = d * d if ssq is None else ssq + d * d
    var_c = jnp.sum(jnp.dot(pavg_ref[...], ssq,
                            preferred_element_type=jnp.float32),
                    axis=1, keepdims=True) * inv_cnt                      # (C, 1)
    scale = jax.lax.rsqrt(var_c + EPS) * ga_ref[...]
    shift = be_ref[...] - mean_c * scale

    # GN + ReLU per offset block, then maxpool = elementwise max over the 4 blocks.
    pooled = None
    for y in ys:
        yn = jnp.maximum(y * scale + shift, 0.0)
        pooled = yn if pooled is None else jnp.maximum(pooled, yn)
    pool_ref[...] = pooled


def _fc_kernel(h_ref, w1_ref, b1_ref, g3_ref, be3_ref, pavg_ref,
               w2_ref, b2_ref, w3_ref, b3_ref,
               f3_ref, f4_ref, lp_ref):
    """fc1 + GroupNorm(4,120) + ReLU + fc2 + ReLU + fc3 + log_softmax for one row tile."""
    h = h_ref[...]                                                        # (TN, 400)
    z1 = jnp.dot(h, w1_ref[...], preferred_element_type=jnp.float32) + b1_ref[...]
    f3_ref[...] = z1                                                      # feature3

    # Row-wise GroupNorm via the (symmetric) group-averaging matrix.
    mean_c = jnp.dot(z1, pavg_ref[...], preferred_element_type=jnp.float32)
    d = z1 - mean_c
    var_c = jnp.dot(d * d, pavg_ref[...], preferred_element_type=jnp.float32)
    y = jnp.maximum(d * jax.lax.rsqrt(var_c + EPS) * g3_ref[...] + be3_ref[...], 0.0)

    z2 = jnp.dot(y, w2_ref[...], preferred_element_type=jnp.float32) + b2_ref[...]
    f4_ref[...] = z2                                                      # feature4
    z3 = jnp.dot(jnp.maximum(z2, 0.0), w3_ref[...],
                 preferred_element_type=jnp.float32) + b3_ref[...]

    s = z3 - jnp.max(z3, axis=1, keepdims=True)
    lp_ref[...] = s - jnp.log(jnp.sum(jnp.exp(s), axis=1, keepdims=True))


# ---------------------------------------------------------------------------
# Host-side packing helpers (cheap XLA glue, outside the kernels)
# ---------------------------------------------------------------------------
def _group_avg_matrix(channels, num_groups):
    cg = channels // num_groups
    m = np.zeros((channels, channels), np.float32)
    for g in range(num_groups):
        m[g * cg:(g + 1) * cg, g * cg:(g + 1) * cg] = 1.0 / cg
    return jnp.asarray(m)


def _build_pool_patches(x, ksize, kpad):
    """im2col with rows grouped by 2x2 pooling-window offset.

    x: (N, C, H, W)  ->  (N, 4, kpad, (OH//2)*(OW//2)); block a*2+b holds the patches of
    conv output positions (2i+a, 2j+b), so the pool reduces over the leading block dim.
    """
    n, c, h, w = x.shape
    oh, ow = h - ksize + 1, w - ksize + 1
    ph, pw = oh // 2, ow // 2
    cols = [x[:, :, di:di + oh, dj:dj + ow]
            for di in range(ksize) for dj in range(ksize)]
    pat = jnp.stack(cols, axis=2)                          # (N, C, k*k, OH, OW)
    pat = pat.reshape(n, c, ksize * ksize, ph, 2, pw, 2)   # (N, C, KK, i, a, j, b)
    pat = pat.transpose(0, 4, 6, 1, 2, 3, 5)               # (N, a, b, C, KK, i, j)
    pat = pat.reshape(n, 4, c * ksize * ksize, ph * pw)
    return jnp.pad(pat, ((0, 0), (0, 0), (0, kpad - c * ksize * ksize), (0, 0)))


# ---------------------------------------------------------------------------
# Fused layer wrappers
# ---------------------------------------------------------------------------
def conv_gn_relu_pool(x, w, b, gamma, beta, num_groups):
    """Fused conv(k, valid, stride 1) + bias + GroupNorm + ReLU + 2x2 maxpool (NCHW)."""
    n, cin, h, wd = x.shape
    oc, _, ks, _ = w.shape
    oh, ow = h - ks + 1, wd - ks + 1
    ph, pw = oh // 2, ow // 2
    s = ph * pw
    k = cin * ks * ks
    kpad = ((k + 127) // 128) * 128            # pad contraction dim to a 128-multiple

    patches = _build_pool_patches(x, ks, kpad)                      # (N, 4, kpad, S)
    wmat = jnp.pad(w.reshape(oc, k), ((0, 0), (0, kpad - k)))       # (OC, kpad)
    pavg = _group_avg_matrix(oc, num_groups)

    kern = functools.partial(_conv_gn_pool_kernel, inv_cnt=1.0 / (4 * s))
    feat_perm, pooled = pl.pallas_call(
        kern,
        grid=(n,),
        in_specs=[
            pl.BlockSpec((None, 4, kpad, s), lambda i: (i, 0, 0, 0)),
            pl.BlockSpec((oc, kpad), lambda i: (0, 0)),
            pl.BlockSpec((oc, 1), lambda i: (0, 0)),
            pl.BlockSpec((oc, 1), lambda i: (0, 0)),
            pl.BlockSpec((oc, 1), lambda i: (0, 0)),
            pl.BlockSpec((oc, oc), lambda i: (0, 0)),
        ],
        out_specs=(
            pl.BlockSpec((None, 4, oc, s), lambda i: (i, 0, 0, 0)),
            pl.BlockSpec((None, oc, s), lambda i: (i, 0, 0)),
        ),
        out_shape=(
            jax.ShapeDtypeStruct((n, 4, oc, s), jnp.float32),
            jax.ShapeDtypeStruct((n, oc, s), jnp.float32),
        ),
        compiler_params=pltpu.CompilerParams(dimension_semantics=("parallel",)),
    )(patches, wmat, b.reshape(oc, 1), gamma.reshape(oc, 1), beta.reshape(oc, 1), pavg)

    # Un-permute the raw conv output back to NCHW (it is only returned, not re-used).
    feat = (feat_perm.reshape(n, 2, 2, oc, ph, pw)
            .transpose(0, 3, 4, 1, 5, 2)
            .reshape(n, oc, oh, ow))
    return feat, pooled.reshape(n, oc, ph, pw)


def fc_head(h, p, num_groups=4):
    """fc1 + GroupNorm + ReLU + fc2 + ReLU + fc3 + log_softmax in one fused kernel."""
    n, din = h.shape
    tn = 8                                       # sublane-aligned row tile
    n_pad = ((n + tn - 1) // tn) * tn
    h_pad = jnp.pad(h, ((0, n_pad - n), (0, 0)))

    w1 = p["fc1_w"].T                            # (400, 120)
    w2 = p["fc2_w"].T                            # (120, 84)
    w3 = p["fc3_w"].T                            # (84, num_classes)
    d1, d2, d3 = w1.shape[1], w2.shape[1], w3.shape[1]
    pavg = _group_avg_matrix(d1, num_groups)

    def full(shape):
        return pl.BlockSpec(shape, lambda i: (0,) * len(shape))

    def row(cols):
        return pl.BlockSpec((tn, cols), lambda i: (i, 0))

    f3, f4, lp = pl.pallas_call(
        _fc_kernel,
        grid=(n_pad // tn,),
        in_specs=[
            row(din),
            full(w1.shape), full((1, d1)), full((1, d1)), full((1, d1)),
            full(pavg.shape),
            full(w2.shape), full((1, d2)),
            full(w3.shape), full((1, d3)),
        ],
        out_specs=(row(d1), row(d2), row(d3)),
        out_shape=(
            jax.ShapeDtypeStruct((n_pad, d1), jnp.float32),
            jax.ShapeDtypeStruct((n_pad, d2), jnp.float32),
            jax.ShapeDtypeStruct((n_pad, d3), jnp.float32),
        ),
        compiler_params=pltpu.CompilerParams(dimension_semantics=("parallel",)),
    )(h_pad, w1, p["fc1_b"].reshape(1, d1),
      p["bn3_g"].reshape(1, d1), p["bn3_b"].reshape(1, d1), pavg,
      w2, p["fc2_b"].reshape(1, d2), w3, p["fc3_b"].reshape(1, d3))
    return f3[:n], f4[:n], lp[:n]


# ---------------------------------------------------------------------------
# Parameters (deterministic synthetic init, PyTorch-like uniform)
# ---------------------------------------------------------------------------
def init_params(key, num_classes=10):
    def u(k, shape, fan_in):
        bound = 1.0 / np.sqrt(fan_in)
        return jax.random.uniform(k, shape, jnp.float32, -bound, bound)

    ks = jax.random.split(key, 10)
    p = {}
    p["conv1_w"] = u(ks[0], (6, 3, 5, 5), 3 * 5 * 5)
    p["conv1_b"] = u(ks[1], (6,), 3 * 5 * 5)
    p["conv2_w"] = u(ks[2], (16, 6, 5, 5), 6 * 5 * 5)
    p["conv2_b"] = u(ks[3], (16,), 6 * 5 * 5)
    p["fc1_w"] = u(ks[4], (120, 400), 400)
    p["fc1_b"] = u(ks[5], (120,), 400)
    p["fc2_w"] = u(ks[6], (84, 120), 120)
    p["fc2_b"] = u(ks[7], (84,), 120)
    p["fc3_w"] = u(ks[8], (num_classes, 84), 84)
    p["fc3_b"] = u(ks[9], (num_classes,), 84)
    # GroupNorm affine params (PyTorch default: weight=1, bias=0)
    p["bn1_g"] = jnp.ones((6,), jnp.float32)
    p["bn1_b"] = jnp.zeros((6,), jnp.float32)
    p["bn2_g"] = jnp.ones((16,), jnp.float32)
    p["bn2_b"] = jnp.zeros((16,), jnp.float32)
    p["bn3_g"] = jnp.ones((120,), jnp.float32)
    p["bn3_b"] = jnp.zeros((120,), jnp.float32)
    return p


# ---------------------------------------------------------------------------
# Forward pass (matches CNNCifar_norm.forward with norm='gn')
# ---------------------------------------------------------------------------
@jax.jit
def forward(p, x):
    # TODO(synk): the FEATURES.content global side-effect list has no Pallas equivalent;
    # the intermediate features are returned instead (as the module also does).
    feature1, h = conv_gn_relu_pool(x, p["conv1_w"], p["conv1_b"],
                                    p["bn1_g"], p["bn1_b"], num_groups=2)   # (N,6,28,28)->(N,6,14,14)
    feature2, h = conv_gn_relu_pool(h, p["conv2_w"], p["conv2_b"],
                                    p["bn2_g"], p["bn2_b"], num_groups=4)   # (N,16,10,10)->(N,16,5,5)
    h = h.reshape(h.shape[0], -1)                                           # (N,400), PyTorch order
    feature3, feature4, logp = fc_head(h, p, num_groups=4)                  # norm != 'in' branch
    return logp, [feature1, feature2, feature3, feature4], 0


# ---------------------------------------------------------------------------
# Pure-JAX reference (sanity check)
# ---------------------------------------------------------------------------
def ref_forward(p, x):
    def conv(x, w, b):
        y = jax.lax.conv_general_dilated(
            x, w, (1, 1), "VALID", dimension_numbers=("NCHW", "OIHW", "NCHW"))
        return y + b.reshape(1, -1, 1, 1)

    def gn2d(x, g, b, ng):
        n, c, h, w = x.shape
        xr = x.reshape(n, ng, -1)
        m = xr.mean(-1, keepdims=True)
        v = ((xr - m) ** 2).mean(-1, keepdims=True)
        xr = (xr - m) / jnp.sqrt(v + EPS)
        return xr.reshape(n, c, h, w) * g.reshape(1, -1, 1, 1) + b.reshape(1, -1, 1, 1)

    def gn1d(x, g, b, ng):
        n, c = x.shape
        xr = x.reshape(n, ng, -1)
        m = xr.mean(-1, keepdims=True)
        v = ((xr - m) ** 2).mean(-1, keepdims=True)
        xr = (xr - m) / jnp.sqrt(v + EPS)
        return xr.reshape(n, c) * g.reshape(1, -1) + b.reshape(1, -1)

    def pool(x):
        n, c, h, w = x.shape
        return x.reshape(n, c, h // 2, 2, w // 2, 2).max(axis=(3, 5))

    f1 = conv(x, p["conv1_w"], p["conv1_b"])
    h = pool(jax.nn.relu(gn2d(f1, p["bn1_g"], p["bn1_b"], 2)))
    f2 = conv(h, p["conv2_w"], p["conv2_b"])
    h = pool(jax.nn.relu(gn2d(f2, p["bn2_g"], p["bn2_b"], 4)))
    h = h.reshape(h.shape[0], -1)
    f3 = h @ p["fc1_w"].T + p["fc1_b"]
    h = jax.nn.relu(gn1d(f3, p["bn3_g"], p["bn3_b"], 4))
    f4 = h @ p["fc2_w"].T + p["fc2_b"]
    logits = jax.nn.relu(f4) @ p["fc3_w"].T + p["fc3_b"]
    return jax.nn.log_softmax(logits, axis=1), [f1, f2, f3, f4]


# ---------------------------------------------------------------------------
if __name__ == "__main__":
    key = jax.random.PRNGKey(0)
    kx, kp = jax.random.split(key)

    batch, num_classes = 2, 10
    x = jax.random.normal(kx, (batch, 3, 32, 32), jnp.float32)   # CIFAR NCHW
    params = init_params(kp, num_classes=num_classes)

    logp, feats, zero = forward(params, x)
    jax.block_until_ready(logp)

    ref_logp, _ = ref_forward(params, x)
    np.testing.assert_allclose(np.asarray(logp), np.asarray(ref_logp),
                               rtol=1e-2, atol=1e-2)
    assert logp.shape == (batch, num_classes)
    assert feats[0].shape == (batch, 6, 28, 28)
    assert feats[1].shape == (batch, 16, 10, 10)
    assert feats[2].shape == (batch, 120)
    assert feats[3].shape == (batch, 84)
    assert zero == 0

    print("KERNEL_OK")
</pallas_src>

<mosaic_0001>
module attributes {stable_mosaic.version = 11 : i64} {
  func.func @_conv_gn_pool_kernel(%arg0: i32, %arg1: memref<1x4x128x196xf32, #tpu.memory_space<vmem>>, %arg2: memref<6x128xf32, #tpu.memory_space<vmem>>, %arg3: memref<6x1xf32, #tpu.memory_space<vmem>>, %arg4: memref<6x1xf32, #tpu.memory_space<vmem>>, %arg5: memref<6x1xf32, #tpu.memory_space<vmem>>, %arg6: memref<6x6xf32, #tpu.memory_space<vmem>>, %arg7: memref<1x4x6x196xf32, #tpu.memory_space<vmem>>, %arg8: memref<1x6x196xf32, #tpu.memory_space<vmem>>) attributes {dimension_semantics = [#tpu.dimension_semantics<parallel>], iteration_bounds = array<i64: 2>, scalar_prefetch = 0 : i64, scratch_operands = 0 : i64, tpu.core_type = #tpu.core_type<tc>, window_params = [{transform_indices = @transform_0, window_bounds = array<i64: 1, 4, 128, 196>}, {pipeline_mode = #tpu.pipeline_mode<synchronous>, transform_indices = @transform_1, window_bounds = array<i64: 6, 128>}, {pipeline_mode = #tpu.pipeline_mode<synchronous>, transform_indices = @transform_2, window_bounds = array<i64: 6, 1>}, {pipeline_mode = #tpu.pipeline_mode<synchronous>, transform_indices = @transform_3, window_bounds = array<i64: 6, 1>}, {pipeline_mode = #tpu.pipeline_mode<synchronous>, transform_indices = @transform_4, window_bounds = array<i64: 6, 1>}, {pipeline_mode = #tpu.pipeline_mode<synchronous>, transform_indices = @transform_5, window_bounds = array<i64: 6, 6>}, {transform_indices = @transform_6, window_bounds = array<i64: 1, 4, 6, 196>}, {transform_indices = @transform_7, window_bounds = array<i64: 1, 6, 196>}]} {
    %c0 = arith.constant 0 : index
    %c0_0 = arith.constant 0 : index
    %0 = vector.load %arg2[%c0, %c0_0] : memref<6x128xf32, #tpu.memory_space<vmem>>, vector<6x128xf32>
    %c0_1 = arith.constant 0 : index
    %c0_2 = arith.constant 0 : index
    %1 = vector.load %arg3[%c0_1, %c0_2] : memref<6x1xf32, #tpu.memory_space<vmem>>, vector<6x1xf32>
    %c0_3 = arith.constant 0 : index
    %c0_4 = arith.constant 0 : index
    %c0_5 = arith.constant 0 : index
    %c0_6 = arith.constant 0 : index
    %2 = vector.load %arg1[%c0_3, %c0_4, %c0_5, %c0_6] : memref<1x4x128x196xf32, #tpu.memory_space<vmem>>, vector<1x1x128x196xf32>
    %3 = vector.shape_cast %2 : vector<1x1x128x196xf32> to vector<128x196xf32>
    %cst = arith.constant dense<0.000000e+00> : vector<6x196xf32>
    %4 = tpu.matmul %0, %3, %cst {dimension_numbers = #tpu.dot_dimension_numbers<[1], [0], [0], [1], [0, 0, 1, 1], [], []>} : vector<6x128xf32>, vector<128x196xf32>, vector<6x196xf32> -> vector<6x196xf32>
    %5 = vector.broadcast %1 : vector<6x1xf32> to vector<6x196xf32>
    %6 = arith.addf %4, %5 : vector<6x196xf32>
    %c0_7 = arith.constant 0 : index
    %c0_8 = arith.constant 0 : index
    %c0_9 = arith.constant 0 : index
    %c0_10 = arith.constant 0 : index
    %7 = vector.load %arg7[%c0_7, %c0_8, %c0_9, %c0_10] : memref<1x4x6x196xf32, #tpu.memory_space<vmem>>, vector<1x1x6x196xf32>
    %8 = vector.shape_cast %7 : vector<1x1x6x196xf32> to vector<6x196xf32>
    %9 = vector.shape_cast %6 : vector<6x196xf32> to vector<1x1x6x196xf32>
    tpu.vector_store %arg7[%c0_7, %c0_8, %c0_9, %c0_10], %9 {strides = array<i32>} : memref<1x4x6x196xf32, #tpu.memory_space<vmem>>, vector<1x1x6x196xf32>,
    %c0_11 = arith.constant 0 : index
    %c1 = arith.constant 1 : index
    %c0_12 = arith.constant 0 : index
    %c0_13 = arith.constant 0 : index
    %10 = vector.load %arg1[%c0_11, %c1, %c0_12, %c0_13] : memref<1x4x128x196xf32, #tpu.memory_space<vmem>>, vector<1x1x128x196xf32>
    %11 = vector.shape_cast %10 : vector<1x1x128x196xf32> to vector<128x196xf32>
    %cst_14 = arith.constant dense<0.000000e+00> : vector<6x196xf32>
    %12 = tpu.matmul %0, %11, %cst_14 {dimension_numbers = #tpu.dot_dimension_numbers<[1], [0], [0], [1], [0, 0, 1, 1], [], []>} : vector<6x128xf32>, vector<128x196xf32>, vector<6x196xf32> -> vector<6x196xf32>
    %13 = vector.broadcast %1 : vector<6x1xf32> to vector<6x196xf32>
    %14 = arith.addf %12, %13 : vector<6x196xf32>
    %c0_15 = arith.constant 0 : index
    %c1_16 = arith.constant 1 : index
    %c0_17 = arith.constant 0 : index
    %c0_18 = arith.constant 0 : index
    %15 = vector.load %arg7[%c0_15, %c1_16, %c0_17, %c0_18] : memref<1x4x6x196xf32, #tpu.memory_space<vmem>>, vector<1x1x6x196xf32>
    %16 = vector.shape_cast %15 : vector<1x1x6x196xf32> to vector<6x196xf32>
    %17 = vector.shape_cast %14 : vector<6x196xf32> to vector<1x1x6x196xf32>
    tpu.vector_store %arg7[%c0_15, %c1_16, %c0_17, %c0_18], %17 {strides = array<i32>} : memref<1x4x6x196xf32, #tpu.memory_space<vmem>>, vector<1x1x6x196xf32>,
    %c0_19 = arith.constant 0 : index
    %c2 = arith.constant 2 : index
    %c0_20 = arith.constant 0 : index
    %c0_21 = arith.constant 0 : index
    %18 = vector.load %arg1[%c0_19, %c2, %c0_20, %c0_21] : memref<1x4x128x196xf32, #tpu.memory_space<vmem>>, vector<1x1x128x196xf32>
    %19 = vector.shape_cast %18 : vector<1x1x128x196xf32> to vector<128x196xf32>
    %cst_22 = arith.constant dense<0.000000e+00> : vector<6x196xf32>
    %20 = tpu.matmul %0, %19, %cst_22 {dimension_numbers = #tpu.dot_dimension_numbers<[1], [0], [0], [1], [0, 0, 1, 1], [], []>} : vector<6x128xf32>, vector<128x196xf32>, vector<6x196xf32> -> vector<6x196xf32>
    %21 = vector.broadcast %1 : vector<6x1xf32> to vector<6x196xf32>
    %22 = arith.addf %20, %21 : vector<6x196xf32>
    %c0_23 = arith.constant 0 : index
    %c2_24 = arith.constant 2 : index
    %c0_25 = arith.constant 0 : index
    %c0_26 = arith.constant 0 : index
    %23 = vector.load %arg7[%c0_23, %c2_24, %c0_25, %c0_26] : memref<1x4x6x196xf32, #tpu.memory_space<vmem>>, vector<1x1x6x196xf32>
    %24 = vector.shape_cast %23 : vector<1x1x6x196xf32> to vector<6x196xf32>
    %25 = vector.shape_cast %22 : vector<6x196xf32> to vector<1x1x6x196xf32>
    tpu.vector_store %arg7[%c0_23, %c2_24, %c0_25, %c0_26], %25 {strides = array<i32>} : memref<1x4x6x196xf32, #tpu.memory_space<vmem>>, vector<1x1x6x196xf32>,
    %c0_27 = arith.constant 0 : index
    %c3 = arith.constant 3 : index
    %c0_28 = arith.constant 0 : index
    %c0_29 = arith.constant 0 : index
    %26 = vector.load %arg1[%c0_27, %c3, %c0_28, %c0_29] : memref<1x4x128x196xf32, #tpu.memory_space<vmem>>, vector<1x1x128x196xf32>
    %27 = vector.shape_cast %26 : vector<1x1x128x196xf32> to vector<128x196xf32>
    %cst_30 = arith.constant dense<0.000000e+00> : vector<6x196xf32>
    %28 = tpu.matmul %0, %27, %cst_30 {dimension_numbers = #tpu.dot_dimension_numbers<[1], [0], [0], [1], [0, 0, 1, 1], [], []>} : vector<6x128xf32>, vector<128x196xf32>, vector<6x196xf32> -> vector<6x196xf32>
    %29 = vector.broadcast %1 : vector<6x1xf32> to vector<6x196xf32>
    %30 = arith.addf %28, %29 : vector<6x196xf32>
    %c0_31 = arith.constant 0 : index
    %c3_32 = arith.constant 3 : index
    %c0_33 = arith.constant 0 : index
    %c0_34 = arith.constant 0 : index
    %31 = vector.load %arg7[%c0_31, %c3_32, %c0_33, %c0_34] : memref<1x4x6x196xf32, #tpu.memory_space<vmem>>, vector<1x1x6x196xf32>
    %32 = vector.shape_cast %31 : vector<1x1x6x196xf32> to vector<6x196xf32>
    %33 = vector.shape_cast %30 : vector<6x196xf32> to vector<1x1x6x196xf32>
    tpu.vector_store %arg7[%c0_31, %c3_32, %c0_33, %c0_34], %33 {strides = array<i32>} : memref<1x4x6x196xf32, #tpu.memory_space<vmem>>, vector<1x1x6x196xf32>,
    %34 = arith.addf %6, %14 : vector<6x196xf32>
    %35 = arith.addf %34, %22 : vector<6x196xf32>
    %36 = arith.addf %35, %30 : vector<6x196xf32>
    %c0_35 = arith.constant 0 : index
    %c0_36 = arith.constant 0 : index
    %37 = vector.load %arg6[%c0_35, %c0_36] : memref<6x6xf32, #tpu.memory_space<vmem>>, vector<6x6xf32>
    %cst_37 = arith.constant dense<0.000000e+00> : vector<6x196xf32>
    %38 = tpu.matmul %37, %36, %cst_37 {dimension_numbers = #tpu.dot_dimension_numbers<[1], [0], [0], [1], [0, 0, 1, 1], [], []>} : vector<6x6xf32>, vector<6x196xf32>, vector<6x196xf32> -> vector<6x196xf32>
    %cst_38 = arith.constant dense<0.000000e+00> : vector<6xf32>
    %39 = vector.multi_reduction <add>, %38, %cst_38 [1] : vector<6x196xf32> to vector<6xf32>
    %40 = vector.shape_cast %39 : vector<6xf32> to vector<6x1xf32>
    %cst_39 = arith.constant 0.00127551018 : f32
    %41 = vector.broadcast %cst_39 : f32 to vector<6x1xf32>
    %42 = arith.mulf %40, %41 : vector<6x1xf32>
    %43 = vector.broadcast %42 : vector<6x1xf32> to vector<6x196xf32>
    %44 = arith.subf %6, %43 : vector<6x196xf32>
    %45 = arith.mulf %44, %44 : vector<6x196xf32>
    %46 = vector.broadcast %42 : vector<6x1xf32> to vector<6x196xf32>
    %47 = arith.subf %14, %46 : vector<6x196xf32>
    %48 = arith.mulf %47, %47 : vector<6x196xf32>
    %49 = arith.addf %45, %48 : vector<6x196xf32>
    %50 = vector.broadcast %42 : vector<6x1xf32> to vector<6x196xf32>
    %51 = arith.subf %22, %50 : vector<6x196xf32>
    %52 = arith.mulf %51, %51 : vector<6x196xf32>
    %53 = arith.addf %49, %52 : vector<6x196xf32>
    %54 = vector.broadcast %42 : vector<6x1xf32> to vector<6x196xf32>
    %55 = arith.subf %30, %54 : vector<6x196xf32>
    %56 = arith.mulf %55, %55 : vector<6x196xf32>
    %57 = arith.addf %53, %56 : vector<6x196xf32>
    %c0_40 = arith.constant 0 : index
    %c0_41 = arith.constant 0 : index
    %58 = vector.load %arg6[%c0_40, %c0_41] : memref<6x6xf32, #tpu.memory_space<vmem>>, vector<6x6xf32>
    %cst_42 = arith.constant dense<0.000000e+00> : vector<6x196xf32>
    %59 = tpu.matmul %58, %57, %cst_42 {dimension_numbers = #tpu.dot_dimension_numbers<[1], [0], [0], [1], [0, 0, 1, 1], [], []>} : vector<6x6xf32>, vector<6x196xf32>, vector<6x196xf32> -> vector<6x196xf32>
    %cst_43 = arith.constant dense<0.000000e+00> : vector<6xf32>
    %60 = vector.multi_reduction <add>, %59, %cst_43 [1] : vector<6x196xf32> to vector<6xf32>
    %61 = vector.shape_cast %60 : vector<6xf32> to vector<6x1xf32>
    %cst_44 = arith.constant 0.00127551018 : f32
    %62 = vector.broadcast %cst_44 : f32 to vector<6x1xf32>
    %63 = arith.mulf %61, %62 : vector<6x1xf32>
    %cst_45 = arith.constant 9.99999974E-6 : f32
    %64 = vector.broadcast %cst_45 : f32 to vector<6x1xf32>
    %65 = arith.addf %63, %64 : vector<6x1xf32>
    %66 = math.rsqrt %65 : vector<6x1xf32>
    %c0_46 = arith.constant 0 : index
    %c0_47 = arith.constant 0 : index
    %67 = vector.load %arg4[%c0_46, %c0_47] : memref<6x1xf32, #tpu.memory_space<vmem>>, vector<6x1xf32>
    %68 = arith.mulf %66, %67 : vector<6x1xf32>
    %c0_48 = arith.constant 0 : index
    %c0_49 = arith.constant 0 : index
    %69 = vector.load %arg5[%c0_48, %c0_49] : memref<6x1xf32, #tpu.memory_space<vmem>>, vector<6x1xf32>
    %70 = arith.mulf %42, %68 : vector<6x1xf32>
    %71 = arith.subf %69, %70 : vector<6x1xf32>
    %72 = vector.broadcast %68 : vector<6x1xf32> to vector<6x196xf32>
    %73 = arith.mulf %6, %72 : vector<6x196xf32>
    %74 = vector.broadcast %71 : vector<6x1xf32> to vector<6x196xf32>
    %75 = arith.addf %73, %74 : vector<6x196xf32>
    %cst_50 = arith.constant 0.000000e+00 : f32
    %76 = vector.broadcast %cst_50 : f32 to vector<6x196xf32>
    %77 = arith.maximumf %75, %76 : vector<6x196xf32>
    %78 = vector.broadcast %68 : vector<6x1xf32> to vector<6x196xf32>
    %79 = arith.mulf %14, %78 : vector<6x196xf32>
    %80 = vector.broadcast %71 : vector<6x1xf32> to vector<6x196xf32>
    %81 = arith.addf %79, %80 : vector<6x196xf32>
    %cst_51 = arith.constant 0.000000e+00 : f32
    %82 = vector.broadcast %cst_51 : f32 to vector<6x196xf32>
    %83 = arith.maximumf %81, %82 : vector<6x196xf32>
    %84 = arith.maximumf %77, %83 : vector<6x196xf32>
    %85 = vector.broadcast %68 : vector<6x1xf32> to vector<6x196xf32>
    %86 = arith.mulf %22, %85 : vector<6x196xf32>
    %87 = vector.broadcast %71 : vector<6x1xf32> to vector<6x196xf32>
    %88 = arith.addf %86, %87 : vector<6x196xf32>
    %cst_52 = arith.constant 0.000000e+00 : f32
    %89 = vector.broadcast %cst_52 : f32 to vector<6x196xf32>
    %90 = arith.maximumf %88, %89 : vector<6x196xf32>
    %91 = arith.maximumf %84, %90 : vector<6x196xf32>
    %92 = vector.broadcast %68 : vector<6x1xf32> to vector<6x196xf32>
    %93 = arith.mulf %30, %92 : vector<6x196xf32>
    %94 = vector.broadcast %71 : vector<6x1xf32> to vector<6x196xf32>
    %95 = arith.addf %93, %94 : vector<6x196xf32>
    %cst_53 = arith.constant 0.000000e+00 : f32
    %96 = vector.broadcast %cst_53 : f32 to vector<6x196xf32>
    %97 = arith.maximumf %95, %96 : vector<6x196xf32>
    %98 = arith.maximumf %91, %97 : vector<6x196xf32>
    %c0_54 = arith.constant 0 : index
    %c0_55 = arith.constant 0 : index
    %c0_56 = arith.constant 0 : index
    %99 = vector.load %arg8[%c0_54, %c0_55, %c0_56] : memref<1x6x196xf32, #tpu.memory_space<vmem>>, vector<1x6x196xf32>
    %100 = vector.shape_cast %99 : vector<1x6x196xf32> to vector<6x196xf32>
    %101 = vector.shape_cast %98 : vector<6x196xf32> to vector<1x6x196xf32>
    tpu.vector_store %arg8[%c0_54, %c0_55, %c0_56], %101 {strides = array<i32>} : memref<1x6x196xf32, #tpu.memory_space<vmem>>, vector<1x6x196xf32>,
    return
  }
  func.func @transform_0(%arg0: i32) -> (i32, i32, i32, i32) {
    %c0_i32 = arith.constant 0 : i32
    %c0_i32_0 = arith.constant 0 : i32
    %c0_i32_1 = arith.constant 0 : i32
    %c0_i32_2 = arith.constant 0 : i32
    return %arg0, %c0_i32, %c0_i32_0, %c0_i32_1 : i32, i32, i32, i32
  }
  func.func @transform_1(%arg0: i32) -> (i32, i32) {
    %c0_i32 = arith.constant 0 : i32
    %c0_i32_0 = arith.constant 0 : i32
    %c0_i32_1 = arith.constant 0 : i32
    return %c0_i32, %c0_i32_0 : i32, i32
  }
  func.func @transform_2(%arg0: i32) -> (i32, i32) {
    %c0_i32 = arith.constant 0 : i32
    %c0_i32_0 = arith.constant 0 : i32
    %c0_i32_1 = arith.constant 0 : i32
    return %c0_i32, %c0_i32_0 : i32, i32
  }
  func.func @transform_3(%arg0: i32) -> (i32, i32) {
    %c0_i32 = arith.constant 0 : i32
    %c0_i32_0 = arith.constant 0 : i32
    %c0_i32_1 = arith.constant 0 : i32
    return %c0_i32, %c0_i32_0 : i32, i32
  }
  func.func @transform_4(%arg0: i32) -> (i32, i32) {
    %c0_i32 = arith.constant 0 : i32
    %c0_i32_0 = arith.constant 0 : i32
    %c0_i32_1 = arith.constant 0 : i32
    return %c0_i32, %c0_i32_0 : i32, i32
  }
  func.func @transform_5(%arg0: i32) -> (i32, i32) {
    %c0_i32 = arith.constant 0 : i32
    %c0_i32_0 = arith.constant 0 : i32
    %c0_i32_1 = arith.constant 0 : i32
    return %c0_i32, %c0_i32_0 : i32, i32
  }
  func.func @transform_6(%arg0: i32) -> (i32, i32, i32, i32) {
    %c0_i32 = arith.constant 0 : i32
    %c0_i32_0 = arith.constant 0 : i32
    %c0_i32_1 = arith.constant 0 : i32
    %c0_i32_2 = arith.constant 0 : i32
    return %arg0, %c0_i32, %c0_i32_0, %c0_i32_1 : i32, i32, i32, i32
  }
  func.func @transform_7(%arg0: i32) -> (i32, i32, i32) {
    %c0_i32 = arith.constant 0 : i32
    %c0_i32_0 = arith.constant 0 : i32
    %c0_i32_1 = arith.constant 0 : i32
    return %arg0, %c0_i32, %c0_i32_0 : i32, i32, i32
  }
}

module attributes {stable_mosaic.version = 11 : i64} {
  func.func @_conv_gn_pool_kernel(%arg0: i32, %arg1: memref<1x4x256x25xf32, #tpu.memory_space<vmem>>, %arg2: memref<16x256xf32, #tpu.memory_space<vmem>>, %arg3: memref<16x1xf32, #tpu.memory_space<vmem>>, %arg4: memref<16x1xf32, #tpu.memory_space<vmem>>, %arg5: memref<16x1xf32, #tpu.memory_space<vmem>>, %arg6: memref<16x16xf32, #tpu.memory_space<vmem>>, %arg7: memref<1x4x16x25xf32, #tpu.memory_space<vmem>>, %arg8: memref<1x16x25xf32, #tpu.memory_space<vmem>>) attributes {dimension_semantics = [#tpu.dimension_semantics<parallel>], iteration_bounds = array<i64: 2>, scalar_prefetch = 0 : i64, scratch_operands = 0 : i64, tpu.core_type = #tpu.core_type<tc>, window_params = [{transform_indices = @transform_0, window_bounds = array<i64: 1, 4, 256, 25>}, {pipeline_mode = #tpu.pipeline_mode<synchronous>, transform_indices = @transform_1, window_bounds = array<i64: 16, 256>}, {pipeline_mode = #tpu.pipeline_mode<synchronous>, transform_indices = @transform_2, window_bounds = array<i64: 16, 1>}, {pipeline_mode = #tpu.pipeline_mode<synchronous>, transform_indices = @transform_3, window_bounds = array<i64: 16, 1>}, {pipeline_mode = #tpu.pipeline_mode<synchronous>, transform_indices = @transform_4, window_bounds = array<i64: 16, 1>}, {pipeline_mode = #tpu.pipeline_mode<synchronous>, transform_indices = @transform_5, window_bounds = array<i64: 16, 16>}, {transform_indices = @transform_6, window_bounds = array<i64: 1, 4, 16, 25>}, {transform_indices = @transform_7, window_bounds = array<i64: 1, 16, 25>}]} {
    %c0 = arith.constant 0 : index
    %c0_0 = arith.constant 0 : index
    %0 = vector.load %arg2[%c0, %c0_0] : memref<16x256xf32, #tpu.memory_space<vmem>>, vector<16x256xf32>
    %c0_1 = arith.constant 0 : index
    %c0_2 = arith.constant 0 : index
    %1 = vector.load %arg3[%c0_1, %c0_2] : memref<16x1xf32, #tpu.memory_space<vmem>>, vector<16x1xf32>
    %c0_3 = arith.constant 0 : index
    %c0_4 = arith.constant 0 : index
    %c0_5 = arith.constant 0 : index
    %c0_6 = arith.constant 0 : index
    %2 = vector.load %arg1[%c0_3, %c0_4, %c0_5, %c0_6] : memref<1x4x256x25xf32, #tpu.memory_space<vmem>>, vector<1x1x256x25xf32>
    %3 = vector.shape_cast %2 : vector<1x1x256x25xf32> to vector<256x25xf32>
    %cst = arith.constant dense<0.000000e+00> : vector<16x25xf32>
    %4 = tpu.matmul %0, %3, %cst {dimension_numbers = #tpu.dot_dimension_numbers<[1], [0], [0], [1], [0, 0, 1, 1], [], []>} : vector<16x256xf32>, vector<256x25xf32>, vector<16x25xf32> -> vector<16x25xf32>
    %5 = vector.broadcast %1 : vector<16x1xf32> to vector<16x25xf32>
    %6 = arith.addf %4, %5 : vector<16x25xf32>
    %c0_7 = arith.constant 0 : index
    %c0_8 = arith.constant 0 : index
    %c0_9 = arith.constant 0 : index
    %c0_10 = arith.constant 0 : index
    %7 = vector.load %arg7[%c0_7, %c0_8, %c0_9, %c0_10] : memref<1x4x16x25xf32, #tpu.memory_space<vmem>>, vector<1x1x16x25xf32>
    %8 = vector.shape_cast %7 : vector<1x1x16x25xf32> to vector<16x25xf32>
    %9 = vector.shape_cast %6 : vector<16x25xf32> to vector<1x1x16x25xf32>
    tpu.vector_store %arg7[%c0_7, %c0_8, %c0_9, %c0_10], %9 {strides = array<i32>} : memref<1x4x16x25xf32, #tpu.memory_space<vmem>>, vector<1x1x16x25xf32>,
    %c0_11 = arith.constant 0 : index
    %c1 = arith.constant 1 : index
    %c0_12 = arith.constant 0 : index
    %c0_13 = arith.constant 0 : index
    %10 = vector.load %arg1[%c0_11, %c1, %c0_12, %c0_13] : memref<1x4x256x25xf32, #tpu.memory_space<vmem>>, vector<1x1x256x25xf32>
    %11 = vector.shape_cast %10 : vector<1x1x256x25xf32> to vector<256x25xf32>
    %cst_14 = arith.constant dense<0.000000e+00> : vector<16x25xf32>
    %12 = tpu.matmul %0, %11, %cst_14 {dimension_numbers = #tpu.dot_dimension_numbers<[1], [0], [0], [1], [0, 0, 1, 1], [], []>} : vector<16x256xf32>, vector<256x25xf32>, vector<16x25xf32> -> vector<16x25xf32>
    %13 = vector.broadcast %1 : vector<16x1xf32> to vector<16x25xf32>
    %14 = arith.addf %12, %13 : vector<16x25xf32>
    %c0_15 = arith.constant 0 : index
    %c1_16 = arith.constant 1 : index
    %c0_17 = arith.constant 0 : index
    %c0_18 = arith.constant 0 : index
    %15 = vector.load %arg7[%c0_15, %c1_16, %c0_17, %c0_18] : memref<1x4x16x25xf32, #tpu.memory_space<vmem>>, vector<1x1x16x25xf32>
    %16 = vector.shape_cast %15 : vector<1x1x16x25xf32> to vector<16x25xf32>
    %17 = vector.shape_cast %14 : vector<16x25xf32> to vector<1x1x16x25xf32>
    tpu.vector_store %arg7[%c0_15, %c1_16, %c0_17, %c0_18], %17 {strides = array<i32>} : memref<1x4x16x25xf32, #tpu.memory_space<vmem>>, vector<1x1x16x25xf32>,
    %c0_19 = arith.constant 0 : index
    %c2 = arith.constant 2 : index
    %c0_20 = arith.constant 0 : index
    %c0_21 = arith.constant 0 : index
    %18 = vector.load %arg1[%c0_19, %c2, %c0_20, %c0_21] : memref<1x4x256x25xf32, #tpu.memory_space<vmem>>, vector<1x1x256x25xf32>
    %19 = vector.shape_cast %18 : vector<1x1x256x25xf32> to vector<256x25xf32>
    %cst_22 = arith.constant dense<0.000000e+00> : vector<16x25xf32>
    %20 = tpu.matmul %0, %19, %cst_22 {dimension_numbers = #tpu.dot_dimension_numbers<[1], [0], [0], [1], [0, 0, 1, 1], [], []>} : vector<16x256xf32>, vector<256x25xf32>, vector<16x25xf32> -> vector<16x25xf32>
    %21 = vector.broadcast %1 : vector<16x1xf32> to vector<16x25xf32>
    %22 = arith.addf %20, %21 : vector<16x25xf32>
    %c0_23 = arith.constant 0 : index
    %c2_24 = arith.constant 2 : index
    %c0_25 = arith.constant 0 : index
    %c0_26 = arith.constant 0 : index
    %23 = vector.load %arg7[%c0_23, %c2_24, %c0_25, %c0_26] : memref<1x4x16x25xf32, #tpu.memory_space<vmem>>, vector<1x1x16x25xf32>
    %24 = vector.shape_cast %23 : vector<1x1x16x25xf32> to vector<16x25xf32>
    %25 = vector.shape_cast %22 : vector<16x25xf32> to vector<1x1x16x25xf32>
    tpu.vector_store %arg7[%c0_23, %c2_24, %c0_25, %c0_26], %25 {strides = array<i32>} : memref<1x4x16x25xf32, #tpu.memory_space<vmem>>, vector<1x1x16x25xf32>,
    %c0_27 = arith.constant 0 : index
    %c3 = arith.constant 3 : index
    %c0_28 = arith.constant 0 : index
    %c0_29 = arith.constant 0 : index
    %26 = vector.load %arg1[%c0_27, %c3, %c0_28, %c0_29] : memref<1x4x256x25xf32, #tpu.memory_space<vmem>>, vector<1x1x256x25xf32>
    %27 = vector.shape_cast %26 : vector<1x1x256x25xf32> to vector<256x25xf32>
    %cst_30 = arith.constant dense<0.000000e+00> : vector<16x25xf32>
    %28 = tpu.matmul %0, %27, %cst_30 {dimension_numbers = #tpu.dot_dimension_numbers<[1], [0], [0], [1], [0, 0, 1, 1], [], []>} : vector<16x256xf32>, vector<256x25xf32>, vector<16x25xf32> -> vector<16x25xf32>
    %29 = vector.broadcast %1 : vector<16x1xf32> to vector<16x25xf32>
    %30 = arith.addf %28, %29 : vector<16x25xf32>
    %c0_31 = arith.constant 0 : index
    %c3_32 = arith.constant 3 : index
    %c0_33 = arith.constant 0 : index
    %c0_34 = arith.constant 0 : index
    %31 = vector.load %arg7[%c0_31, %c3_32, %c0_33, %c0_34] : memref<1x4x16x25xf32, #tpu.memory_space<vmem>>, vector<1x1x16x25xf32>
    %32 = vector.shape_cast %31 : vector<1x1x16x25xf32> to vector<16x25xf32>
    %33 = vector.shape_cast %30 : vector<16x25xf32> to vector<1x1x16x25xf32>
    tpu.vector_store %arg7[%c0_31, %c3_32, %c0_33, %c0_34], %33 {strides = array<i32>} : memref<1x4x16x25xf32, #tpu.memory_space<vmem>>, vector<1x1x16x25xf32>,
    %34 = arith.addf %6, %14 : vector<16x25xf32>
    %35 = arith.addf %34, %22 : vector<16x25xf32>
    %36 = arith.addf %35, %30 : vector<16x25xf32>
    %c0_35 = arith.constant 0 : index
    %c0_36 = arith.constant 0 : index
    %37 = vector.load %arg6[%c0_35, %c0_36] : memref<16x16xf32, #tpu.memory_space<vmem>>, vector<16x16xf32>
    %cst_37 = arith.constant dense<0.000000e+00> : vector<16x25xf32>
    %38 = tpu.matmul %37, %36, %cst_37 {dimension_numbers = #tpu.dot_dimension_numbers<[1], [0], [0], [1], [0, 0, 1, 1], [], []>} : vector<16x16xf32>, vector<16x25xf32>, vector<16x25xf32> -> vector<16x25xf32>
    %cst_38 = arith.constant dense<0.000000e+00> : vector<16xf32>
    %39 = vector.multi_reduction <add>, %38, %cst_38 [1] : vector<16x25xf32> to vector<16xf32>
    %40 = vector.shape_cast %39 : vector<16xf32> to vector<16x1xf32>
    %cst_39 = arith.constant 0.00999999977 : f32
    %41 = vector.broadcast %cst_39 : f32 to vector<16x1xf32>
    %42 = arith.mulf %40, %41 : vector<16x1xf32>
    %43 = vector.broadcast %42 : vector<16x1xf32> to vector<16x25xf32>
    %44 = arith.subf %6, %43 : vector<16x25xf32>
    %45 = arith.mulf %44, %44 : vector<16x25xf32>
    %46 = vector.broadcast %42 : vector<16x1xf32> to vector<16x25xf32>
    %47 = arith.subf %14, %46 : vector<16x25xf32>
    %48 = arith.mulf %47, %47 : vector<16x25xf32>
    %49 = arith.addf %45, %48 : vector<16x25xf32>
    %50 = vector.broadcast %42 : vector<16x1xf32> to vector<16x25xf32>
    %51 = arith.subf %22, %50 : vector<16x25xf32>
    %52 = arith.mulf %51, %51 : vector<16x25xf32>
    %53 = arith.addf %49, %52 : vector<16x25xf32>
    %54 = vector.broadcast %42 : vector<16x1xf32> to vector<16x25xf32>
    %55 = arith.subf %30, %54 : vector<16x25xf32>
    %56 = arith.mulf %55, %55 : vector<16x25xf32>
    %57 = arith.addf %53, %56 : vector<16x25xf32>
    %c0_40 = arith.constant 0 : index
    %c0_41 = arith.constant 0 : index
    %58 = vector.load %arg6[%c0_40, %c0_41] : memref<16x16xf32, #tpu.memory_space<vmem>>, vector<16x16xf32>
    %cst_42 = arith.constant dense<0.000000e+00> : vector<16x25xf32>
    %59 = tpu.matmul %58, %57, %cst_42 {dimension_numbers = #tpu.dot_dimension_numbers<[1], [0], [0], [1], [0, 0, 1, 1], [], []>} : vector<16x16xf32>, vector<16x25xf32>, vector<16x25xf32> -> vector<16x25xf32>
    %cst_43 = arith.constant dense<0.000000e+00> : vector<16xf32>
    %60 = vector.multi_reduction <add>, %59, %cst_43 [1] : vector<16x25xf32> to vector<16xf32>
    %61 = vector.shape_cast %60 : vector<16xf32> to vector<16x1xf32>
    %cst_44 = arith.constant 0.00999999977 : f32
    %62 = vector.broadcast %cst_44 : f32 to vector<16x1xf32>
    %63 = arith.mulf %61, %62 : vector<16x1xf32>
    %cst_45 = arith.constant 9.99999974E-6 : f32
    %64 = vector.broadcast %cst_45 : f32 to vector<16x1xf32>
    %65 = arith.addf %63, %64 : vector<16x1xf32>
    %66 = math.rsqrt %65 : vector<16x1xf32>
    %c0_46 = arith.constant 0 : index
    %c0_47 = arith.constant 0 : index
    %67 = vector.load %arg4[%c0_46, %c0_47] : memref<16x1xf32, #tpu.memory_space<vmem>>, vector<16x1xf32>
    %68 = arith.mulf %66, %67 : vector<16x1xf32>
    %c0_48 = arith.constant 0 : index
    %c0_49 = arith.constant 0 : index
    %69 = vector.load %arg5[%c0_48, %c0_49] : memref<16x1xf32, #tpu.memory_space<vmem>>, vector<16x1xf32>
    %70 = arith.mulf %42, %68 : vector<16x1xf32>
    %71 = arith.subf %69, %70 : vector<16x1xf32>
    %72 = vector.broadcast %68 : vector<16x1xf32> to vector<16x25xf32>
    %73 = arith.mulf %6, %72 : vector<16x25xf32>
    %74 = vector.broadcast %71 : vector<16x1xf32> to vector<16x25xf32>
    %75 = arith.addf %73, %74 : vector<16x25xf32>
    %cst_50 = arith.constant 0.000000e+00 : f32
    %76 = vector.broadcast %cst_50 : f32 to vector<16x25xf32>
    %77 = arith.maximumf %75, %76 : vector<16x25xf32>
    %78 = vector.broadcast %68 : vector<16x1xf32> to vector<16x25xf32>
    %79 = arith.mulf %14, %78 : vector<16x25xf32>
    %80 = vector.broadcast %71 : vector<16x1xf32> to vector<16x25xf32>
    %81 = arith.addf %79, %80 : vector<16x25xf32>
    %cst_51 = arith.constant 0.000000e+00 : f32
    %82 = vector.broadcast %cst_51 : f32 to vector<16x25xf32>
    %83 = arith.maximumf %81, %82 : vector<16x25xf32>
    %84 = arith.maximumf %77, %83 : vector<16x25xf32>
    %85 = vector.broadcast %68 : vector<16x1xf32> to vector<16x25xf32>
    %86 = arith.mulf %22, %85 : vector<16x25xf32>
    %87 = vector.broadcast %71 : vector<16x1xf32> to vector<16x25xf32>
    %88 = arith.addf %86, %87 : vector<16x25xf32>
    %cst_52 = arith.constant 0.000000e+00 : f32
    %89 = vector.broadcast %cst_52 : f32 to vector<16x25xf32>
    %90 = arith.maximumf %88, %89 : vector<16x25xf32>
    %91 = arith.maximumf %84, %90 : vector<16x25xf32>
    %92 = vector.broadcast %68 : vector<16x1xf32> to vector<16x25xf32>
    %93 = arith.mulf %30, %92 : vector<16x25xf32>
    %94 = vector.broadcast %71 : vector<16x1xf32> to vector<16x25xf32>
    %95 = arith.addf %93, %94 : vector<16x25xf32>
    %cst_53 = arith.constant 0.000000e+00 : f32
    %96 = vector.broadcast %cst_53 : f32 to vector<16x25xf32>
    %97 = arith.maximumf %95, %96 : vector<16x25xf32>
    %98 = arith.maximumf %91, %97 : vector<16x25xf32>
    %c0_54 = arith.constant 0 : index
    %c0_55 = arith.constant 0 : index
    %c0_56 = arith.constant 0 : index
    %99 = vector.load %arg8[%c0_54, %c0_55, %c0_56] : memref<1x16x25xf32, #tpu.memory_space<vmem>>, vector<1x16x25xf32>
    %100 = vector.shape_cast %99 : vector<1x16x25xf32> to vector<16x25xf32>
    %101 = vector.shape_cast %98 : vector<16x25xf32> to vector<1x16x25xf32>
    tpu.vector_store %arg8[%c0_54, %c0_55, %c0_56], %101 {strides = array<i32>} : memref<1x16x25xf32, #tpu.memory_space<vmem>>, vector<1x16x25xf32>,
    return
  }
  func.func @transform_0(%arg0: i32) -> (i32, i32, i32, i32) {
    %c0_i32 = arith.constant 0 : i32
    %c0_i32_0 = arith.constant 0 : i32
    %c0_i32_1 = arith.constant 0 : i32
    %c0_i32_2 = arith.constant 0 : i32
    return %arg0, %c0_i32, %c0_i32_0, %c0_i32_1 : i32, i32, i32, i32
  }
  func.func @transform_1(%arg0: i32) -> (i32, i32) {
    %c0_i32 = arith.constant 0 : i32
    %c0_i32_0 = arith.constant 0 : i32
    %c0_i32_1 = arith.constant 0 : i32
    return %c0_i32, %c0_i32_0 : i32, i32
  }
  func.func @transform_2(%arg0: i32) -> (i32, i32) {
    %c0_i32 = arith.constant 0 : i32
    %c0_i32_0 = arith.constant 0 : i32
    %c0_i32_1 = arith.constant 0 : i32
    return %c0_i32, %c0_i32_0 : i32, i32
  }
  func.func @transform_3(%arg0: i32) -> (i32, i32) {
    %c0_i32 = arith.constant 0 : i32
    %c0_i32_0 = arith.constant 0 : i32
    %c0_i32_1 = arith.constant 0 : i32
    return %c0_i32, %c0_i32_0 : i32, i32
  }
  func.func @transform_4(%arg0: i32) -> (i32, i32) {
    %c0_i32 = arith.constant 0 : i32
    %c0_i32_0 = arith.constant 0 : i32
    %c0_i32_1 = arith.constant 0 : i32
    return %c0_i32, %c0_i32_0 : i32, i32
  }
  func.func @transform_5(%arg0: i32) -> (i32, i32) {
    %c0_i32 = arith.constant 0 : i32
    %c0_i32_0 = arith.constant 0 : i32
    %c0_i32_1 = arith.constant 0 : i32
    return %c0_i32, %c0_i32_0 : i32, i32
  }
  func.func @transform_6(%arg0: i32) -> (i32, i32, i32, i32) {
    %c0_i32 = arith.constant 0 : i32
    %c0_i32_0 = arith.constant 0 : i32
    %c0_i32_1 = arith.constant 0 : i32
    %c0_i32_2 = arith.constant 0 : i32
    return %arg0, %c0_i32, %c0_i32_0, %c0_i32_1 : i32, i32, i32, i32
  }
  func.func @transform_7(%arg0: i32) -> (i32, i32, i32) {
    %c0_i32 = arith.constant 0 : i32
    %c0_i32_0 = arith.constant 0 : i32
    %c0_i32_1 = arith.constant 0 : i32
    return %arg0, %c0_i32, %c0_i32_0 : i32, i32, i32
  }
}

module attributes {stable_mosaic.version = 11 : i64} {
  func.func @_fc_kernel(%arg0: i32, %arg1: memref<8x400xf32, #tpu.memory_space<vmem>>, %arg2: memref<400x120xf32, #tpu.memory_space<vmem>>, %arg3: memref<1x120xf32, #tpu.memory_space<vmem>>, %arg4: memref<1x120xf32, #tpu.memory_space<vmem>>, %arg5: memref<1x120xf32, #tpu.memory_space<vmem>>, %arg6: memref<120x120xf32, #tpu.memory_space<vmem>>, %arg7: memref<120x84xf32, #tpu.memory_space<vmem>>, %arg8: memref<1x84xf32, #tpu.memory_space<vmem>>, %arg9: memref<84x10xf32, #tpu.memory_space<vmem>>, %arg10: memref<1x10xf32, #tpu.memory_space<vmem>>, %arg11: memref<8x120xf32, #tpu.memory_space<vmem>>, %arg12: memref<8x84xf32, #tpu.memory_space<vmem>>, %arg13: memref<8x10xf32, #tpu.memory_space<vmem>>) attributes {dimension_semantics = [#tpu.dimension_semantics<parallel>], iteration_bounds = array<i64: 1>, scalar_prefetch = 0 : i64, scratch_operands = 0 : i64, tpu.core_type = #tpu.core_type<tc>, window_params = [{transform_indices = @transform_0, window_bounds = array<i64: 8, 400>}, {pipeline_mode = #tpu.pipeline_mode<synchronous>, transform_indices = @transform_1, window_bounds = array<i64: 400, 120>}, {pipeline_mode = #tpu.pipeline_mode<synchronous>, transform_indices = @transform_2, window_bounds = array<i64: 1, 120>}, {pipeline_mode = #tpu.pipeline_mode<synchronous>, transform_indices = @transform_3, window_bounds = array<i64: 1, 120>}, {pipeline_mode = #tpu.pipeline_mode<synchronous>, transform_indices = @transform_4, window_bounds = array<i64: 1, 120>}, {pipeline_mode = #tpu.pipeline_mode<synchronous>, transform_indices = @transform_5, window_bounds = array<i64: 120, 120>}, {pipeline_mode = #tpu.pipeline_mode<synchronous>, transform_indices = @transform_6, window_bounds = array<i64: 120, 84>}, {pipeline_mode = #tpu.pipeline_mode<synchronous>, transform_indices = @transform_7, window_bounds = array<i64: 1, 84>}, {pipeline_mode = #tpu.pipeline_mode<synchronous>, transform_indices = @transform_8, window_bounds = array<i64: 84, 10>}, {pipeline_mode = #tpu.pipeline_mode<synchronous>, transform_indices = @transform_9, window_bounds = array<i64: 1, 10>}, {transform_indices = @transform_10, window_bounds = array<i64: 8, 120>}, {transform_indices = @transform_11, window_bounds = array<i64: 8, 84>}, {transform_indices = @transform_12, window_bounds = array<i64: 8, 10>}]} {
    %c0 = arith.constant 0 : index
    %c0_0 = arith.constant 0 : index
    %0 = vector.load %arg1[%c0, %c0_0] : memref<8x400xf32, #tpu.memory_space<vmem>>, vector<8x400xf32>
    %c0_1 = arith.constant 0 : index
    %c0_2 = arith.constant 0 : index
    %1 = vector.load %arg2[%c0_1, %c0_2] : memref<400x120xf32, #tpu.memory_space<vmem>>, vector<400x120xf32>
    %cst = arith.constant dense<0.000000e+00> : vector<8x120xf32>
    %2 = tpu.matmul %0, %1, %cst {dimension_numbers = #tpu.dot_dimension_numbers<[1], [0], [0], [1], [0, 0, 1, 1], [], []>} : vector<8x400xf32>, vector<400x120xf32>, vector<8x120xf32> -> vector<8x120xf32>
    %c0_3 = arith.constant 0 : index
    %c0_4 = arith.constant 0 : index
    %3 = vector.load %arg3[%c0_3, %c0_4] : memref<1x120xf32, #tpu.memory_space<vmem>>, vector<1x120xf32>
    %4 = vector.broadcast %3 : vector<1x120xf32> to vector<8x120xf32>
    %5 = arith.addf %2, %4 : vector<8x120xf32>
    %c0_5 = arith.constant 0 : index
    %c0_6 = arith.constant 0 : index
    %6 = vector.load %arg11[%c0_5, %c0_6] : memref<8x120xf32, #tpu.memory_space<vmem>>, vector<8x120xf32>
    tpu.vector_store %arg11[%c0_5, %c0_6], %5 {strides = array<i32>} : memref<8x120xf32, #tpu.memory_space<vmem>>, vector<8x120xf32>,
    %c0_7 = arith.constant 0 : index
    %c0_8 = arith.constant 0 : index
    %7 = vector.load %arg6[%c0_7, %c0_8] : memref<120x120xf32, #tpu.memory_space<vmem>>, vector<120x120xf32>
    %cst_9 = arith.constant dense<0.000000e+00> : vector<8x120xf32>
    %8 = tpu.matmul %5, %7, %cst_9 {dimension_numbers = #tpu.dot_dimension_numbers<[1], [0], [0], [1], [0, 0, 1, 1], [], []>} : vector<8x120xf32>, vector<120x120xf32>, vector<8x120xf32> -> vector<8x120xf32>
    %9 = arith.subf %5, %8 : vector<8x120xf32>
    %10 = arith.mulf %9, %9 : vector<8x120xf32>
    %c0_10 = arith.constant 0 : index
    %c0_11 = arith.constant 0 : index
    %11 = vector.load %arg6[%c0_10, %c0_11] : memref<120x120xf32, #tpu.memory_space<vmem>>, vector<120x120xf32>
    %cst_12 = arith.constant dense<0.000000e+00> : vector<8x120xf32>
    %12 = tpu.matmul %10, %11, %cst_12 {dimension_numbers = #tpu.dot_dimension_numbers<[1], [0], [0], [1], [0, 0, 1, 1], [], []>} : vector<8x120xf32>, vector<120x120xf32>, vector<8x120xf32> -> vector<8x120xf32>
    %cst_13 = arith.constant 9.99999974E-6 : f32
    %13 = vector.broadcast %cst_13 : f32 to vector<8x120xf32>
    %14 = arith.addf %12, %13 : vector<8x120xf32>
    %15 = math.rsqrt %14 : vector<8x120xf32>
    %16 = arith.mulf %9, %15 : vector<8x120xf32>
    %c0_14 = arith.constant 0 : index
    %c0_15 = arith.constant 0 : index
    %17 = vector.load %arg4[%c0_14, %c0_15] : memref<1x120xf32, #tpu.memory_space<vmem>>, vector<1x120xf32>
    %18 = vector.broadcast %17 : vector<1x120xf32> to vector<8x120xf32>
    %19 = arith.mulf %16, %18 : vector<8x120xf32>
    %c0_16 = arith.constant 0 : index
    %c0_17 = arith.constant 0 : index
    %20 = vector.load %arg5[%c0_16, %c0_17] : memref<1x120xf32, #tpu.memory_space<vmem>>, vector<1x120xf32>
    %21 = vector.broadcast %20 : vector<1x120xf32> to vector<8x120xf32>
    %22 = arith.addf %19, %21 : vector<8x120xf32>
    %cst_18 = arith.constant 0.000000e+00 : f32
    %23 = vector.broadcast %cst_18 : f32 to vector<8x120xf32>
    %24 = arith.maximumf %22, %23 : vector<8x120xf32>
    %c0_19 = arith.constant 0 : index
    %c0_20 = arith.constant 0 : index
    %25 = vector.load %arg7[%c0_19, %c0_20] : memref<120x84xf32, #tpu.memory_space<vmem>>, vector<120x84xf32>
    %cst_21 = arith.constant dense<0.000000e+00> : vector<8x84xf32>
    %26 = tpu.matmul %24, %25, %cst_21 {dimension_numbers = #tpu.dot_dimension_numbers<[1], [0], [0], [1], [0, 0, 1, 1], [], []>} : vector<8x120xf32>, vector<120x84xf32>, vector<8x84xf32> -> vector<8x84xf32>
    %c0_22 = arith.constant 0 : index
    %c0_23 = arith.constant 0 : index
    %27 = vector.load %arg8[%c0_22, %c0_23] : memref<1x84xf32, #tpu.memory_space<vmem>>, vector<1x84xf32>
    %28 = vector.broadcast %27 : vector<1x84xf32> to vector<8x84xf32>
    %29 = arith.addf %26, %28 : vector<8x84xf32>
    %c0_24 = arith.constant 0 : index
    %c0_25 = arith.constant 0 : index
    %30 = vector.load %arg12[%c0_24, %c0_25] : memref<8x84xf32, #tpu.memory_space<vmem>>, vector<8x84xf32>
    tpu.vector_store %arg12[%c0_24, %c0_25], %29 {strides = array<i32>} : memref<8x84xf32, #tpu.memory_space<vmem>>, vector<8x84xf32>,
    %cst_26 = arith.constant 0.000000e+00 : f32
    %31 = vector.broadcast %cst_26 : f32 to vector<8x84xf32>
    %32 = arith.maximumf %29, %31 : vector<8x84xf32>
    %c0_27 = arith.constant 0 : index
    %c0_28 = arith.constant 0 : index
    %33 = vector.load %arg9[%c0_27, %c0_28] : memref<84x10xf32, #tpu.memory_space<vmem>>, vector<84x10xf32>
    %cst_29 = arith.constant dense<0.000000e+00> : vector<8x10xf32>
    %34 = tpu.matmul %32, %33, %cst_29 {dimension_numbers = #tpu.dot_dimension_numbers<[1], [0], [0], [1], [0, 0, 1, 1], [], []>} : vector<8x84xf32>, vector<84x10xf32>, vector<8x10xf32> -> vector<8x10xf32>
    %c0_30 = arith.constant 0 : index
    %c0_31 = arith.constant 0 : index
    %35 = vector.load %arg10[%c0_30, %c0_31] : memref<1x10xf32, #tpu.memory_space<vmem>>, vector<1x10xf32>
    %36 = vector.broadcast %35 : vector<1x10xf32> to vector<8x10xf32>
    %37 = arith.addf %34, %36 : vector<8x10xf32>
    %cst_32 = arith.constant dense<0xFF800000> : vector<8xf32>
    %38 = vector.multi_reduction <maximumf>, %37, %cst_32 [1] : vector<8x10xf32> to vector<8xf32>
    %39 = vector.shape_cast %38 : vector<8xf32> to vector<8x1xf32>
    %40 = vector.broadcast %39 : vector<8x1xf32> to vector<8x10xf32>
    %41 = arith.subf %37, %40 : vector<8x10xf32>
    %42 = math.exp %41 : vector<8x10xf32>
    %cst_33 = arith.constant dense<0.000000e+00> : vector<8xf32>
    %43 = vector.multi_reduction <add>, %42, %cst_33 [1] : vector<8x10xf32> to vector<8xf32>
    %44 = vector.shape_cast %43 : vector<8xf32> to vector<8x1xf32>
    %45 = math.log %44 : vector<8x1xf32>
    %46 = vector.broadcast %45 : vector<8x1xf32> to vector<8x10xf32>
    %47 = arith.subf %41, %46 : vector<8x10xf32>
    %c0_34 = arith.constant 0 : index
    %c0_35 = arith.constant 0 : index
    %48 = vector.load %arg13[%c0_34, %c0_35] : memref<8x10xf32, #tpu.memory_space<vmem>>, vector<8x10xf32>
    tpu.vector_store %arg13[%c0_34, %c0_35], %47 {strides = array<i32>} : memref<8x10xf32, #tpu.memory_space<vmem>>, vector<8x10xf32>,
    return
  }
  func.func @transform_0(%arg0: i32) -> (i32, i32) {
    %c0_i32 = arith.constant 0 : i32
    %c0_i32_0 = arith.constant 0 : i32
    return %arg0, %c0_i32 : i32, i32
  }
  func.func @transform_1(%arg0: i32) -> (i32, i32) {
    %c0_i32 = arith.constant 0 : i32
    %c0_i32_0 = arith.constant 0 : i32
    %c0_i32_1 = arith.constant 0 : i32
    return %c0_i32, %c0_i32_0 : i32, i32
  }
  func.func @transform_2(%arg0: i32) -> (i32, i32) {
    %c0_i32 = arith.constant 0 : i32
    %c0_i32_0 = arith.constant 0 : i32
    %c0_i32_1 = arith.constant 0 : i32
    return %c0_i32, %c0_i32_0 : i32, i32
  }
  func.func @transform_3(%arg0: i32) -> (i32, i32) {
    %c0_i32 = arith.constant 0 : i32
    %c0_i32_0 = arith.constant 0 : i32
    %c0_i32_1 = arith.constant 0 : i32
    return %c0_i32, %c0_i32_0 : i32, i32
  }
  func.func @transform_4(%arg0: i32) -> (i32, i32) {
    %c0_i32 = arith.constant 0 : i32
    %c0_i32_0 = arith.constant 0 : i32
    %c0_i32_1 = arith.constant 0 : i32
    return %c0_i32, %c0_i32_0 : i32, i32
  }
  func.func @transform_5(%arg0: i32) -> (i32, i32) {
    %c0_i32 = arith.constant 0 : i32
    %c0_i32_0 = arith.constant 0 : i32
    %c0_i32_1 = arith.constant 0 : i32
    return %c0_i32, %c0_i32_0 : i32, i32
  }
  func.func @transform_6(%arg0: i32) -> (i32, i32) {
    %c0_i32 = arith.constant 0 : i32
    %c0_i32_0 = arith.constant 0 : i32
    %c0_i32_1 = arith.constant 0 : i32
    return %c0_i32, %c0_i32_0 : i32, i32
  }
  func.func @transform_7(%arg0: i32) -> (i32, i32) {
    %c0_i32 = arith.constant 0 : i32
    %c0_i32_0 = arith.constant 0 : i32
    %c0_i32_1 = arith.constant 0 : i32
    return %c0_i32, %c0_i32_0 : i32, i32
  }
  func.func @transform_8(%arg0: i32) -> (i32, i32) {
    %c0_i32 = arith.constant 0 : i32
    %c0_i32_0 = arith.constant 0 : i32
    %c0_i32_1 = arith.constant 0 : i32
    return %c0_i32, %c0_i32_0 : i32, i32
  }
  func.func @transform_9(%arg0: i32) -> (i32, i32) {
    %c0_i32 = arith.constant 0 : i32
    %c0_i32_0 = arith.constant 0 : i32
    %c0_i32_1 = arith.constant 0 : i32
    return %c0_i32, %c0_i32_0 : i32, i32
  }
  func.func @transform_10(%arg0: i32) -> (i32, i32) {
    %c0_i32 = arith.constant 0 : i32
    %c0_i32_0 = arith.constant 0 : i32
    return %arg0, %c0_i32 : i32, i32
  }
  func.func @transform_11(%arg0: i32) -> (i32, i32) {
    %c0_i32 = arith.constant 0 : i32
    %c0_i32_0 = arith.constant 0 : i32
    return %arg0, %c0_i32 : i32, i32
  }
  func.func @transform_12(%arg0: i32) -> (i32, i32) {
    %c0_i32 = arith.constant 0 : i32
    %c0_i32_0 = arith.constant 0 : i32
    return %arg0, %c0_i32 : i32, i32
  }
}

</mosaic_0001>

<bundles_post_ra>
// kernel: forward.3
= control target key start
LH: loop header
LB: loop body
LE: loop exit
PB: predicated region body
PF: predicated region fallthrough
CT: control target
= control target key end

     0   :  { %s1379_s24 = smov 0   ;;  %s1624_s0 = inlined_call_operand.vmem [shape: f32[2,4,128,196], index: 0, kind: input, shape index: {}]   ;;  %s1625_s1 = inlined_call_operand.vmem [shape: f32[6,128], index: 1, kind: input, shape index: {}]   ;;  %s1626_s2 = inlined_call_operand.vmem [shape: f32[6,1], index: 2, kind: input, shape index: {}]   ;;  %s1627_s3 = inlined_call_operand.vmem [shape: f32[6,1], index: 3, kind: input, shape index: {}]   ;;  %s1628_s4 = inlined_call_operand.vmem [shape: f32[6,1], index: 4, kind: input, shape index: {}]   ;;  %s1629_s5 = inlined_call_operand.vmem [shape: f32[6,6], index: 5, kind: input, shape index: {}]   ;;  %s1630_s6 = inlined_call_operand.vmem [shape: f32[2,4,6,196], index: 6, kind: output, shape index: {0}]   ;;  %s1631_s7 = inlined_call_operand.vmem [shape: f32[2,6,196], index: 7, kind: output, shape index: {1}]  }
   0x1 LB: > { %s1063_s25 = sadd.s32 4294967295, %s1335_s24   ;;  %p1067_p0 = scmp.ge.s32.totalorder %s1335_s24, 1  ;;  %s1335_s24 = sphi %s1379_s24, %s18_s24  }
   0x2   : > { %p240_p1 = scmp.lt.s32.totalorder %s1335_s24, 3 }
   0x4   : > { %p241_p2 = pnand %p1067_p0, %p240_p1 }
   0x5   : > { %p277_p3 = scmp.lt.s32.totalorder (!%p241_p2), %s1063_s25, 1  ;;  %v1337_v0 = vmov (!%p241_p2), 0.0   ;;  %v293_v1 = vld [vmem:[%s1626_s2] sm:$0x3f] (!%p241_p2)  ;;  %v1338_v2 = vmov (!%p241_p2), 0   ;;  %vm403_vm0 = vcmask (!%p241_p2), 553984  }
   0x6   : > { %244 = sbr.rel (%p241_p2) target bundleno = 1194 (0x4aa), region = 44  ;;  %395 = vmatprep.mubr.f32.mxu0 (!%p241_p2), %v1337_v0  ;;  %502 = vmatprep.mubr.f32.mxu1 (!%p241_p2), %v1337_v0  ;;  %vm737_vm1 = vcmask (!%p241_p2), 1045504   ;;  %vm733_vm2 = vcmask (!%p241_p2), 48128  }
   0x7   : > { %1325 = vset.pattern.permute.xlu0 (!%p241_p2), %v1338_v2  ;;  %1326 = vset.pattern.permute.xlu1 (!%p241_p2), %v1338_v2 }
   0x8   : > { %328 = vperm.xlu0 (!%p241_p2), %1325, %v293_v1  }
   0xd   : > { %s1633_s25 = smov (!%p277_p3, %s1063_s25), 1 }
   0xe   : > { %s1184_s28 = sshll.u32 %s1633_s25, 10  ;;  %s1185_s11 = sshll.u32 %s1633_s25, 6 }
   0xf   : > { %s1398_s8 = scalar_lea.vmem %s1624_s0, %s1184_s28  ;;  %s286_s14 = scalar_lea.vmem %s1630_s6, %s1185_s11 }
  0x10   : > { %v295_v3 = vld [vmem:[%s1398_s8 + $0x8] sm:$0xff]  ;;  %v297_v4 = vld [vmem:[%s1398_s8 + $0x18] sm:$0xff]  ;;  %v294_v8 = vld [vmem:[%s1398_s8] sm:$0xff]  ;;  %s1186_s21 = sshll.u32 %s1633_s25, 4 }
  0x11   : > { %v1075_v5 = vld [vmem:[%s1398_s8 + $0x108] sm:$0xff]  ;;  %v1187_v6 = vpack.c.bf16 %v297_v4, %v295_v3  ;;  %v1077_v7 = vld [vmem:[%s1398_s8 + $0x118] sm:$0xff]  ;;  %v296_v9 = vld [vmem:[%s1398_s8 + $0x10] sm:$0xff]  ;;  %s291_s26 = scalar_lea.vmem %s1631_s7, %s1186_s21 }
  0x12   : > { %v1219_v10 = vpack.c.bf16 %v1077_v7, %v1075_v5  ;;  %v1189_v11 = vpack.c.bf16 %v296_v9, %v294_v8  ;;  %v1074_v12 = vld [vmem:[%s1398_s8 + $0x100] sm:$0xff]  ;;  %v1076_v13 = vld [vmem:[%s1398_s8 + $0x110] sm:$0xff]  ;;  %v299_v14 = vld [vmem:[%s1398_s8 + $0x28] sm:$0xff] }
  0x13   : > { %1188 = vmatprep.subr.bf16.mxu0 %v1187_v6  ;;  %v1221_v15 = vpack.c.bf16 %v1076_v13, %v1074_v12  ;;  %v301_v16 = vld [vmem:[%s1398_s8 + $0x38] sm:$0xff]  ;;  %v1079_v17 = vld [vmem:[%s1398_s8 + $0x128] sm:$0xff]  ;;  %v298_v21 = vld [vmem:[%s1398_s8 + $0x20] sm:$0xff] }
  0x14   : > { %v1081_v18 = vld [vmem:[%s1398_s8 + $0x138] sm:$0xff]  ;;  %1220 = vmatprep.subr.bf16.mxu1 %v1219_v10  ;;  %1190 = vmatpush1.bf16.msra.mxu0 %v1189_v11  ;;  %v1191_v19 = vpack.c.bf16 %v301_v16, %v299_v14  ;;  %v300_v22 = vld [vmem:[%s1398_s8 + $0x30] sm:$0xff]  ;;  %v1078_v23 = vld [vmem:[%s1398_s8 + $0x120] sm:$0xff] }
  0x15   : > { %v1223_v20 = vpack.c.bf16 %v1081_v18, %v1079_v17  ;;  %1222 = vmatpush1.bf16.msra.mxu1 %v1221_v15  ;;  %v1193_v24 = vpack.c.bf16 %v300_v22, %v298_v21  ;;  %v1080_v25 = vld [vmem:[%s1398_s8 + $0x130] sm:$0xff]  ;;  %v303_v26 = vld [vmem:[%s1398_s8 + $0x48] sm:$0xff]  ;;  %v305_v27 = vld [vmem:[%s1398_s8 + $0x58] sm:$0xff] }
  0x16   : > { %1192 = vmatprep.subr.bf16.mxu0 %v1191_v19  ;;  %v1225_v28 = vpack.c.bf16 %v1080_v25, %v1078_v23  ;;  %v1195_v29 = vpack.c.bf16 %v305_v27, %v303_v26  ;;  %v1083_v30 = vld [vmem:[%s1398_s8 + $0x148] sm:$0xff]  ;;  %v1085_v31 = vld [vmem:[%s1398_s8 + $0x158] sm:$0xff]  ;;  %v302_v32 = vld [vmem:[%s1398_s8 + $0x40] sm:$0xff] }
  0x17   : > { %1224 = vmatprep.subr.bf16.mxu1 %v1223_v20  ;;  %v1227_v33 = vpack.c.bf16 %v1085_v31, %v1083_v30  ;;  %v304_v34 = vld [vmem:[%s1398_s8 + $0x50] sm:$0xff]  ;;  %v1082_v35 = vld [vmem:[%s1398_s8 + $0x140] sm:$0xff]  ;;  %v307_v38 = vld [vmem:[%s1398_s8 + $0x68] sm:$0xff] }
  0x18   : > { %v1084_v36 = vld [vmem:[%s1398_s8 + $0x150] sm:$0xff]  ;;  %1194 = vmatpush1.bf16.msra.mxu0 %v1193_v24  ;;  %v1197_v37 = vpack.c.bf16 %v304_v34, %v302_v32  ;;  %v309_v39 = vld [vmem:[%s1398_s8 + $0x78] sm:$0xff]  ;;  %v1087_v40 = vld [vmem:[%s1398_s8 + $0x168] sm:$0xff] }
  0x19   : > { %1226 = vmatpush1.bf16.msra.mxu1 %v1225_v28  ;;  %1196 = vmatprep.subr.bf16.mxu0 %v1195_v29  ;;  %v1229_v41 = vpack.c.bf16 %v1084_v36, %v1082_v35  ;;  %v1199_v42 = vpack.c.bf16 %v309_v39, %v307_v38  ;;  %v1089_v43 = vld [vmem:[%s1398_s8 + $0x178] sm:$0xff]  ;;  %v306_v44 = vld [vmem:[%s1398_s8 + $0x60] sm:$0xff]  ;;  %v308_v45 = vld [vmem:[%s1398_s8 + $0x70] sm:$0xff] }
  0x1a   : > { %1228 = vmatprep.subr.bf16.mxu1 %v1227_v33  ;;  %v1231_v46 = vpack.c.bf16 %v1089_v43, %v1087_v40  ;;  %v1086_v47 = vld [vmem:[%s1398_s8 + $0x160] sm:$0xff]  ;;  %v1088_v48 = vld [vmem:[%s1398_s8 + $0x170] sm:$0xff]  ;;  %v311_v49 = vld [vmem:[%s1398_s8 + $0x88] sm:$0xff]  ;;  %v1201_v53 = vpack.c.bf16 %v308_v45, %v306_v44 }
  0x1b   : > { %v313_v50 = vld [vmem:[%s1398_s8 + $0x98] sm:$0xff]  ;;  %v1091_v51 = vld [vmem:[%s1398_s8 + $0x188] sm:$0xff]  ;;  %v1233_v54 = vpack.c.bf16 %v1088_v48, %v1086_v47  ;;  %v310_v56 = vld [vmem:[%s1398_s8 + $0x80] sm:$0xff] }
  0x1c   : > { %v1093_v52 = vld [vmem:[%s1398_s8 + $0x198] sm:$0xff]  ;;  %1198 = vmatpush1.bf16.msra.mxu0 %v1197_v37  ;;  %v1203_v55 = vpack.c.bf16 %v313_v50, %v311_v49  ;;  %v312_v57 = vld [vmem:[%s1398_s8 + $0x90] sm:$0xff]  ;;  %v1090_v58 = vld [vmem:[%s1398_s8 + $0x180] sm:$0xff] }
  0x1d   : > { %1230 = vmatpush1.bf16.msra.mxu1 %v1229_v41  ;;  %1200 = vmatprep.subr.bf16.mxu0 %v1199_v42  ;;  %v1235_v59 = vpack.c.bf16 %v1093_v52, %v1091_v51  ;;  %v1092_v60 = vld [vmem:[%s1398_s8 + $0x190] sm:$0xff]  ;;  %v315_v61 = vld [vmem:[%s1398_s8 + $0xa8] sm:$0xff]  ;;  %v317_v62 = vld [vmem:[%s1398_s8 + $0xb8] sm:$0xff]  ;;  %v1205_v2 = vpack.c.bf16 %v312_v57, %v310_v56 }
  0x1e   : > { %1232 = vmatprep.subr.bf16.mxu1 %v1231_v46  ;;  %v1095_v63 = vld [vmem:[%s1398_s8 + $0x1a8] sm:$0xff]  ;;  %v1097_v1 = vld [vmem:[%s1398_s8 + $0x1b8] sm:$0xff]  ;;  %v1237_v3 = vpack.c.bf16 %v1092_v60, %v1090_v58  ;;  %v1207_v4 = vpack.c.bf16 %v317_v62, %v315_v61  ;;  %v314_v5 = vld [vmem:[%s1398_s8 + $0xa0] sm:$0xff] }
  0x1f   : > { %v316_v6 = vld [vmem:[%s1398_s8 + $0xb0] sm:$0xff]  ;;  %v1094_v7 = vld [vmem:[%s1398_s8 + $0x1a0] sm:$0xff]  ;;  %v1239_v8 = vpack.c.bf16 %v1097_v1, %v1095_v63  ;;  %v319_v10 = vld [vmem:[%s1398_s8 + $0xc8] sm:$0xff] }
  0x20   : > { %1202 = vmatpush1.bf16.msra.mxu0 %v1201_v53  ;;  %v1096_v9 = vld [vmem:[%s1398_s8 + $0x1b0] sm:$0xff]  ;;  %v321_v11 = vld [vmem:[%s1398_s8 + $0xd8] sm:$0xff]  ;;  %v1099_v12 = vld [vmem:[%s1398_s8 + $0x1c8] sm:$0xff]  ;;  %v1209_v14 = vpack.c.bf16 %v316_v6, %v314_v5 }
  0x21   : > { %1234 = vmatpush1.bf16.msra.mxu1 %v1233_v54  ;;  %1204 = vmatprep.subr.bf16.mxu0 %v1203_v55  ;;  %v1101_v13 = vld [vmem:[%s1398_s8 + $0x1d8] sm:$0xff]  ;;  %v1241_v15 = vpack.c.bf16 %v1096_v9, %v1094_v7  ;;  %v1211_v16 = vpack.c.bf16 %v321_v11, %v319_v10  ;;  %v318_v17 = vld [vmem:[%s1398_s8 + $0xc0] sm:$0xff]  ;;  %v320_v18 = vld [vmem:[%s1398_s8 + $0xd0] sm:$0xff] }
  0x22   : > { %1236 = vmatprep.subr.bf16.mxu1 %v1235_v59  ;;  %v1098_v19 = vld [vmem:[%s1398_s8 + $0x1c0] sm:$0xff]  ;;  %v1243_v20 = vpack.c.bf16 %v1101_v13, %v1099_v12  ;;  %v1100_v21 = vld [vmem:[%s1398_s8 + $0x1d0] sm:$0xff]  ;;  %v323_v22 = vld [vmem:[%s1398_s8 + $0xe8] sm:$0xff]  ;;  %v1213_v26 = vpack.c.bf16 %v320_v18, %v318_v17 }
  0x23   : > { %v325_v23 = vld [vmem:[%s1398_s8 + $0xf8] sm:$0xff]  ;;  %v1103_v24 = vld [vmem:[%s1398_s8 + $0x1e8] sm:$0xff]  ;;  %v1245_v27 = vpack.c.bf16 %v1100_v21, %v1098_v19  ;;  %v322_v29 = vld [vmem:[%s1398_s8 + $0xe0] sm:$0xff] }
  0x24   : > { %1206 = vmatpush1.bf16.msra.mxu0 %v1205_v2  ;;  %v1105_v25 = vld [vmem:[%s1398_s8 + $0x1f8] sm:$0xff]  ;;  %v1215_v28 = vpack.c.bf16 %v325_v23, %v323_v22  ;;  %v324_v30 = vld [vmem:[%s1398_s8 + $0xf0] sm:$0xff]  ;;  %v1102_v31 = vld [vmem:[%s1398_s8 + $0x1e0] sm:$0xff] }
  0x25   : > { %1238 = vmatpush1.bf16.msra.mxu1 %v1237_v3  ;;  %1208 = vmatprep.subr.bf16.mxu0 %v1207_v4  ;;  %v1247_v32 = vpack.c.bf16 %v1105_v25, %v1103_v24  ;;  %v1104_v33 = vld [vmem:[%s1398_s8 + $0x1f0] sm:$0xff]  ;;  %v1109_v34 = vld [vmem:[%s1398_s8 + $0x208] sm:$0xff]  ;;  %v1111_v35 = vld [vmem:[%s1398_s8 + $0x218] sm:$0xff]  ;;  %v1217_v38 = vpack.c.bf16 %v324_v30, %v322_v29 }
  0x26   : > { %1240 = vmatprep.subr.bf16.mxu1 %v1239_v8  ;;  %v1143_v36 = vld [vmem:[%s1398_s8 + $0x308] sm:$0xff]  ;;  %v1145_v37 = vld [vmem:[%s1398_s8 + $0x318] sm:$0xff]  ;;  %v1249_v39 = vpack.c.bf16 %v1104_v33, %v1102_v31  ;;  %v1251_v40 = vpack.c.bf16 %v1111_v35, %v1109_v34  ;;  %v1108_v41 = vld [vmem:[%s1398_s8 + $0x200] sm:$0xff] }
  0x27   : > { %v1110_v42 = vld [vmem:[%s1398_s8 + $0x210] sm:$0xff]  ;;  %v1142_v43 = vld [vmem:[%s1398_s8 + $0x300] sm:$0xff]  ;;  %v1283_v44 = vpack.c.bf16 %v1145_v37, %v1143_v36  ;;  %v1113_v46 = vld [vmem:[%s1398_s8 + $0x228] sm:$0xff] }
  0x28   : > { %1210 = vmatpush1.bf16.msra.mxu0 %v1209_v14  ;;  %v1144_v45 = vld [vmem:[%s1398_s8 + $0x310] sm:$0xff]  ;;  %v1115_v47 = vld [vmem:[%s1398_s8 + $0x238] sm:$0xff]  ;;  %v1147_v48 = vld [vmem:[%s1398_s8 + $0x328] sm:$0xff]  ;;  %v1253_v51 = vpack.c.bf16 %v1110_v42, %v1108_v41 }
  0x29   : > { %1242 = vmatpush1.bf16.msra.mxu1 %v1241_v15  ;;  %1212 = vmatprep.subr.bf16.mxu0 %v1211_v16  ;;  %v1149_v49 = vld [vmem:[%s1398_s8 + $0x338] sm:$0xff]  ;;  %v1479_v50 = vld [vmem:[%s1625_s1] sm:$0x3f]  ;;  %v1285_v52 = vpack.c.bf16 %v1144_v45, %v1142_v43  ;;  %v1255_v53 = vpack.c.bf16 %v1115_v47, %v1113_v46  ;;  %v1114_v55 = vld [vmem:[%s1398_s8 + $0x230] sm:$0xff] }
  0x2a   : > { %1244 = vmatprep.subr.bf16.mxu1 %v1243_v20  ;;  %v1112_v54 = vld [vmem:[%s1398_s8 + $0x220] sm:$0xff]  ;;  %v1287_v57 = vpack.c.bf16 %v1149_v49, %v1147_v48  ;;  %v1148_v58 = vld [vmem:[%s1398_s8 + $0x330] sm:$0xff]  ;;  %v1117_v59 = vld [vmem:[%s1398_s8 + $0x248] sm:$0xff] }
  0x2b   : > { %v1146_v56 = vld [vmem:[%s1398_s8 + $0x320] sm:$0xff]  ;;  %v1119_v60 = vld [vmem:[%s1398_s8 + $0x258] sm:$0xff]  ;;  %v1151_v61 = vld [vmem:[%s1398_s8 + $0x348] sm:$0xff]  ;;  %v1257_v63 = vpack.c.bf16 %v1114_v55, %v1112_v54 }
  0x2c   : > { %1214 = vmatpush1.bf16.msra.mxu0 %v1213_v26  ;;  %v1153_v62 = vld [vmem:[%s1398_s8 + $0x358] sm:$0xff]  ;;  %v1289_v1 = vpack.c.bf16 %v1148_v58, %v1146_v56  ;;  %v1259_v2 = vpack.c.bf16 %v1119_v60, %v1117_v59  ;;  %v1116_v3 = vld [vmem:[%s1398_s8 + $0x240] sm:$0xff]  ;;  %v1118_v4 = vld [vmem:[%s1398_s8 + $0x250] sm:$0xff] }
  0x2d   : > { %1246 = vmatpush1.bf16.msra.mxu1 %v1245_v27  ;;  %1216 = vmatprep.subr.bf16.mxu0 %v1215_v28  ;;  %v1150_v5 = vld [vmem:[%s1398_s8 + $0x340] sm:$0xff]  ;;  %v1291_v6 = vpack.c.bf16 %v1153_v62, %v1151_v61  ;;  %v1152_v7 = vld [vmem:[%s1398_s8 + $0x350] sm:$0xff]  ;;  %v1121_v8 = vld [vmem:[%s1398_s8 + $0x268] sm:$0xff]  ;;  %v1261_v12 = vpack.c.bf16 %v1118_v4, %v1116_v3 }
  0x2e   : > { %1248 = vmatprep.subr.bf16.mxu1 %v1247_v32  ;;  %v1123_v9 = vld [vmem:[%s1398_s8 + $0x278] sm:$0xff]  ;;  %v1155_v10 = vld [vmem:[%s1398_s8 + $0x368] sm:$0xff]  ;;  %v1293_v13 = vpack.c.bf16 %v1152_v7, %v1150_v5  ;;  %v1120_v15 = vld [vmem:[%s1398_s8 + $0x260] sm:$0xff] }
  0x2f   : > { %v1157_v11 = vld [vmem:[%s1398_s8 + $0x378] sm:$0xff]  ;;  %v1263_v14 = vpack.c.bf16 %v1123_v9, %v1121_v8  ;;  %v1122_v16 = vld [vmem:[%s1398_s8 + $0x270] sm:$0xff]  ;;  %v1154_v17 = vld [vmem:[%s1398_s8 + $0x360] sm:$0xff] }
  0x30   : > { %1218 = vmatpush1.bf16.msra.mxu0 %v1217_v38  ;;  %v1295_v18 = vpack.c.bf16 %v1157_v11, %v1155_v10  ;;  %v1156_v19 = vld [vmem:[%s1398_s8 + $0x370] sm:$0xff]  ;;  %v1125_v20 = vld [vmem:[%s1398_s8 + $0x288] sm:$0xff]  ;;  %v1127_v21 = vld [vmem:[%s1398_s8 + $0x298] sm:$0xff]  ;;  %v1265_v24 = vpack.c.bf16 %v1122_v16, %v1120_v15 }
  0x31   : > { %1250 = vmatpush1.bf16.msra.mxu1 %v1249_v39  ;;  %1252 = vmatprep.subr.bf16.mxu0 %v1251_v40  ;;  %v1159_v22 = vld [vmem:[%s1398_s8 + $0x388] sm:$0xff]  ;;  %v1161_v23 = vld [vmem:[%s1398_s8 + $0x398] sm:$0xff]  ;;  %v1297_v25 = vpack.c.bf16 %v1156_v19, %v1154_v17  ;;  %v1267_v26 = vpack.c.bf16 %v1127_v21, %v1125_v20  ;;  %v1124_v27 = vld [vmem:[%s1398_s8 + $0x280] sm:$0xff] }
  0x32   : > { %1284 = vmatprep.subr.bf16.mxu1 %v1283_v44  ;;  %v1126_v28 = vld [vmem:[%s1398_s8 + $0x290] sm:$0xff]  ;;  %v1158_v29 = vld [vmem:[%s1398_s8 + $0x380] sm:$0xff]  ;;  %v1299_v30 = vpack.c.bf16 %v1161_v23, %v1159_v22  ;;  %v1129_v32 = vld [vmem:[%s1398_s8 + $0x2a8] sm:$0xff] }
  0x33   : > { %396 = vmatmul.mubr.f32.vlgmr.msra.gmra.mrb[0].mxu0 %v1479_v50  ;;  %v1160_v31 = vld [vmem:[%s1398_s8 + $0x390] sm:$0xff]  ;;  %v1131_v33 = vld [vmem:[%s1398_s8 + $0x2b8] sm:$0xff]  ;;  %v1163_v34 = vld [vmem:[%s1398_s8 + $0x3a8] sm:$0xff]  ;;  %v1269_v36 = vpack.c.bf16 %v1126_v28, %v1124_v27 }
  0x34   : > { %503 = vmatmul.mubr.f32.vlgmr.msra.gmra.mrb[0].mxu1 %v1479_v50  ;;  %1254 = vmatpush1.bf16.msra.mxu0 %v1253_v51  ;;  %v1165_v35 = vld [vmem:[%s1398_s8 + $0x3b8] sm:$0xff]  ;;  %v1301_v37 = vpack.c.bf16 %v1160_v31, %v1158_v29  ;;  %v1271_v38 = vpack.c.bf16 %v1131_v33, %v1129_v32  ;;  %v1128_v39 = vld [vmem:[%s1398_s8 + $0x2a0] sm:$0xff]  ;;  %v1130_v40 = vld [vmem:[%s1398_s8 + $0x2b0] sm:$0xff] }
  0x35   : > { %1286 = vmatpush1.bf16.msra.mxu1 %v1285_v52  ;;  %1256 = vmatprep.subr.bf16.mxu0 %v1255_v53  ;;  %v1162_v41 = vld [vmem:[%s1398_s8 + $0x3a0] sm:$0xff]  ;;  %v1303_v42 = vpack.c.bf16 %v1165_v35, %v1163_v34  ;;  %v1164_v43 = vld [vmem:[%s1398_s8 + $0x3b0] sm:$0xff]  ;;  %v1133_v44 = vld [vmem:[%s1398_s8 + $0x2c8] sm:$0xff]  ;;  %v1273_v48 = vpack.c.bf16 %v1130_v40, %v1128_v39 }
  0x36   : > { %1288 = vmatprep.subr.bf16.mxu1 %v1287_v57  ;;  %609 = vmatprep.mubr.f32.mxu0 %v1337_v0  ;;  %v1135_v45 = vld [vmem:[%s1398_s8 + $0x2d8] sm:$0xff]  ;;  %v1167_v46 = vld [vmem:[%s1398_s8 + $0x3c8] sm:$0xff]  ;;  %v1305_v49 = vpack.c.bf16 %v1164_v43, %v1162_v41  ;;  %v1132_v52 = vld [vmem:[%s1398_s8 + $0x2c0] sm:$0xff] }
  0x37   : > { %716 = vmatprep.mubr.f32.mxu1 %v1337_v0  ;;  %v1169_v47 = vld [vmem:[%s1398_s8 + $0x3d8] sm:$0xff]  ;;  %v1275_v51 = vpack.c.bf16 %v1135_v45, %v1133_v44  ;;  %v1134_v53 = vld [vmem:[%s1398_s8 + $0x2d0] sm:$0xff]  ;;  %v1166_v54 = vld [vmem:[%s1398_s8 + $0x3c0] sm:$0xff] }
  0x38   : > { %1258 = vmatpush1.bf16.msra.mxu0 %v1257_v63  ;;  %v1307_v55 = vpack.c.bf16 %v1169_v47, %v1167_v46  ;;  %v1168_v56 = vld [vmem:[%s1398_s8 + $0x3d0] sm:$0xff]  ;;  %v1137_v57 = vld [vmem:[%s1398_s8 + $0x2e8] sm:$0xff]  ;;  %v1139_v58 = vld [vmem:[%s1398_s8 + $0x2f8] sm:$0xff]  ;;  %v1277_v61 = vpack.c.bf16 %v1134_v53, %v1132_v52 }
  0x39   : > { %1290 = vmatpush1.bf16.msra.mxu1 %v1289_v1  ;;  %1260 = vmatprep.subr.bf16.mxu0 %v1259_v2  ;;  %v1171_v59 = vld [vmem:[%s1398_s8 + $0x3e8] sm:$0xff]  ;;  %v1173_v60 = vld [vmem:[%s1398_s8 + $0x3f8] sm:$0xff]  ;;  %v1309_v62 = vpack.c.bf16 %v1168_v56, %v1166_v54  ;;  %v1279_v63 = vpack.c.bf16 %v1139_v58, %v1137_v57  ;;  %v1136_v1 = vld [vmem:[%s1398_s8 + $0x2e0] sm:$0xff] }
  0x3a   : > { %1292 = vmatprep.subr.bf16.mxu1 %v1291_v6  ;;  %v1138_v2 = vld [vmem:[%s1398_s8 + $0x2f0] sm:$0xff]  ;;  %v1311_v3 = vpack.c.bf16 %v1173_v60, %v1171_v59  ;;  %v1170_v4 = vld [vmem:[%s1398_s8 + $0x3e0] sm:$0xff] }
  0x3b   : > { %v1172_v5 = vld [vmem:[%s1398_s8 + $0x3f0] sm:$0xff]  ;;  %v1281_v6 = vpack.c.bf16 %v1138_v2, %v1136_v1  ;;  %v732_v29 = vld [vmem:[%s1629_s5] sm:$0x3f] }
  0x3c   : > { %1262 = vmatpush1.bf16.msra.mxu0 %v1261_v12  ;;  %v1313_v7 = vpack.c.bf16 %v1172_v5, %v1170_v4  ;;  %v928_v5 = vld [vmem:[%s1627_s3] sm:$0x3f] }
  0x3d   : > { %1294 = vmatpush1.bf16.msra.mxu1 %v1293_v13  ;;  %1264 = vmatprep.subr.bf16.mxu0 %v1263_v14 }
  0x3e   : > { %1296 = vmatprep.subr.bf16.mxu1 %v1295_v18 }
  0x40   : > { %1266 = vmatpush1.bf16.msra.mxu0 %v1265_v24 }
  0x41   : > { %1298 = vmatpush1.bf16.msra.mxu1 %v1297_v25  ;;  %1268 = vmatprep.subr.bf16.mxu0 %v1267_v26 }
  0x42   : > { %1300 = vmatprep.subr.bf16.mxu1 %v1299_v30 }
  0x44   : > { %1270 = vmatpush1.bf16.msra.mxu0 %v1269_v36 }
  0x45   : > { %1302 = vmatpush1.bf16.msra.mxu1 %v1301_v37  ;;  %1272 = vmatprep.subr.bf16.mxu0 %v1271_v38 }
  0x46   : > { %1304 = vmatprep.subr.bf16.mxu1 %v1303_v42 }
  0x48   : > { %1274 = vmatpush1.bf16.msra.mxu0 %v1273_v48 }
  0x49   : > { %1306 = vmatpush1.bf16.msra.mxu1 %v1305_v49  ;;  %1276 = vmatprep.subr.bf16.mxu0 %v1275_v51 }
  0x4a   : > { %1308 = vmatprep.subr.bf16.mxu1 %v1307_v55 }
  0x4c   : > { %1278 = vmatpush1.bf16.msra.mxu0 %v1277_v61 }
  0x4d   : > { %1310 = vmatpush1.bf16.msra.mxu1 %v1309_v62  ;;  %1280 = vmatprep.subr.bf16.mxu0 %v1279_v63 }
  0x4e   : > { %1312 = vmatprep.subr.bf16.mxu1 %v1311_v3 }
  0x50   : > { %1282 = vmatpush1.bf16.msra.mxu0 %v1281_v6 }
  0x51   : > { %1314 = vmatpush1.bf16.msra.mxu1 %v1313_v7 }
  0x53   : > { %610 = vmatmul.mubr.f32.vlgmr.msra.gmra.mrb[2].mxu0 %v1479_v50 }
  0x54   : > { %717 = vmatmul.mubr.f32.vlgmr.msra.gmra.mrb[2].mxu1 %v1479_v50  ;;  %808 = vmatprep.mubr.f32.mxu0 %v1337_v0 }
  0x55   : > { %913 = vmatprep.mubr.f32.mxu1 %v1337_v0 }
  0x87   : > { %v329_v8 = vpop.permute.xlu0 %328 }
 0x106   : > { %v397_v9 = vpop.f32.mrb[0].mxu0 }
 0x107   : > { %v504_v10 = vpop.f32.mrb[0].mxu1  ;;  %v399_v11 = vpop.f32.mrb[1].mxu0  ;;  %v1545_v12 = vadd.f32 %v397_v9, %v329_v8 }
 0x108   : > { %v1547_v13 = vadd.f32 %v399_v11, %v329_v8  ;;  %v506_v14 = vpop.f32.mrb[1].mxu1  ;;  %v1549_v50 = vadd.f32 %v504_v10, %v329_v8 }
 0x109   : > { %v1551_v15 = vadd.f32 %v506_v14, %v329_v8  ;;  %402 = vst [vmem:[%s286_s14] sm:$0x3f] %v1545_v12 }
 0x10a   : > { %404 = vst.msk [vmem:[%s286_s14 + $0x8] sm:$0x3f] %vm403_vm0, %v1547_v13  ;;  %1106 = vst [vmem:[%s286_s14 + $0x10] sm:$0x3f] %v1549_v50  ;;  %v726_v17 = vadd.f32 %v1549_v50, %v1545_v12 }
 0x10b   : > { %1107 = vst.msk [vmem:[%s286_s14 + $0x18] sm:$0x3f] %vm403_vm0, %v1551_v15  ;;  %v727_v20 = vadd.f32 %v1551_v15, %v1547_v13 }
 0x126   : > { %v611_v0 = vpop.f32.mrb[2].mxu0 }
 0x127   : > { %v1559_v16 = vadd.f32 %v611_v0, %v329_v8  ;;  %v718_v18 = vpop.f32.mrb[2].mxu1  ;;  %v613_v19 = vpop.f32.mrb[3].mxu0 }
 0x128   : > { %v1565_v21 = vadd.f32 %v718_v18, %v329_v8  ;;  %v1567_v22 = vadd.f32 %v613_v19, %v329_v8  ;;  %v720_v23 = vpop.f32.mrb[3].mxu1 }
 0x129   : > { %1140 = vst [vmem:[%s286_s14 + $0x20] sm:$0x3f] %v1559_v16  ;;  %v728_v24 = vadd.f32 %v726_v17, %v1559_v16  ;;  %v1571_v25 = vadd.f32 %v720_v23, %v329_v8  ;;  %v930_v8 = vld [vmem:[%s1628_s4] sm:$0x3f] }
 0x12a   : > { %1174 = vst [vmem:[%s286_s14 + $0x30] sm:$0x3f] %v1565_v21  ;;  %1141 = vst.msk [vmem:[%s286_s14 + $0x28] sm:$0x3f] %vm403_vm0, %v1567_v22  ;;  %v729_v26 = vadd.f32 %v727_v20, %v1567_v22 }
 0x12b   : > { %1175 = vst.msk [vmem:[%s286_s14 + $0x38] sm:$0x3f] %vm403_vm0, %v1571_v25  ;;  %v730_v28 = vadd.f32 %v728_v24, %v1565_v21 }
 0x12c   : > { %v731_v27 = vadd.f32 %v729_v26, %v1571_v25 }
 0x12e   : > { %1176 = vmatprep.subr.msk.mxu0 %vm737_vm1, %v731_v27 }
 0x12f   : > { %1177 = vmatpush1.msk.msra.mxu0 %vm737_vm1, %v730_v28 }
 0x130   : > { %1178 = vmatmul.mubr.msk.f32.vlgmr.msra.gmra.mrb[4].mxu0 %vm733_vm2, %v732_v29 }
 0x203   : > { %v810_v30 = vpop.f32.mrb[4].mxu0 }
 0x204   : > { %v815_v31 = vsel %vm737_vm1, %v810_v30, 0.0  ;;  %v812_v32 = vpop.f32.mrb[5].mxu0 }
 0x205   : > { %v816_v33 = vsel %vm403_vm0, %v812_v32, 0.0 }
 0x206   : > { %v817_v34 = vadd.f32 %v816_v33, %v815_v31 }
 0x208   : > { %818 = vadd.xlane.f32.xlu0 %v817_v34 }
 0x295   : > { %v819_v35 = vpop.xlane.xlu0 %818 }
 0x296   : > { %v820_v36 = vmul.f32 0.0012755102, %v819_v35 }
 0x298   : > { %v822_v37 = vsub.f32 %v1547_v13, %v820_v36  ;;  %v826_v38 = vsub.f32 %v1551_v15, %v820_v36  ;;  %v832_v39 = vsub.f32 %v1567_v22, %v820_v36  ;;  %v821_v40 = vsub.f32 %v1545_v12, %v820_v36 }
 0x299   : > { %v825_v41 = vsub.f32 %v1549_v50, %v820_v36  ;;  %v831_v42 = vsub.f32 %v1559_v16, %v820_v36  ;;  %v838_v45 = vsub.f32 %v1571_v25, %v820_v36  ;;  %v837_v48 = vsub.f32 %v1565_v21, %v820_v36 }
 0x29a   : > { %v824_v43 = vmul.f32 %v822_v37, %v822_v37  ;;  %v828_v44 = vmul.f32 %v826_v38, %v826_v38  ;;  %v823_v46 = vmul.f32 %v821_v40, %v821_v40  ;;  %v834_v51 = vmul.f32 %v832_v39, %v832_v39 }
 0x29b   : > { %v827_v47 = vmul.f32 %v825_v41, %v825_v41  ;;  %v833_v53 = vmul.f32 %v831_v42, %v831_v42  ;;  %v840_v55 = vmul.f32 %v838_v45, %v838_v45  ;;  %v839_v57 = vmul.f32 %v837_v48, %v837_v48 }
 0x29c   : > { %v830_v49 = vadd.f32 %v828_v44, %v824_v43 }
 0x29d   : > { %v829_v52 = vadd.f32 %v827_v47, %v823_v46 }
 0x29e   : > { %v836_v54 = vadd.f32 %v834_v51, %v830_v49 }
 0x29f   : > { %v835_v56 = vadd.f32 %v833_v53, %v829_v52 }
 0x2a0   : > { %v842_v58 = vadd.f32 %v840_v55, %v836_v54 }
 0x2a1   : > { %v841_v59 = vadd.f32 %v839_v57, %v835_v56 }
 0x2a2   : > { %1179 = vmatprep.subr.msk.mxu1 %vm737_vm1, %v842_v58 }
 0x2a3   : > { %1180 = vmatpush1.msk.msra.mxu1 %vm737_vm1, %v841_v59 }
 0x2a4   : > { %1181 = vmatmul.mubr.msk.f32.vlgmr.msra.gmra.mrb[4].mxu1 %vm733_vm2, %v732_v29 }
 0x377   : > { %v915_v60 = vpop.f32.mrb[4].mxu1 }
 0x378   : > { %v920_v61 = vsel %vm737_vm1, %v915_v60, 0.0  ;;  %v917_v62 = vpop.f32.mrb[5].mxu1 }
 0x379   : > { %v921_v63 = vsel %vm403_vm0, %v917_v62, 0.0 }
 0x37a   : > { %v922_v1 = vadd.f32 %v921_v63, %v920_v61 }
 0x37c   : > { %923 = vadd.xlane.f32.xlu1 %v922_v1 }
 0x409   : > { %v924_v2 = vpop.xlane.xlu1 %923 }
 0x40a   : > { %v925_v3 = vmul.f32 0.0012755102, %v924_v2 }
 0x40c   : > { %v926_v4 = vadd.f32 1e-05, %v925_v3 }
 0x40e   : > { %1327 = vrsqrt.f32 %v926_v4 }
 0x418   : > { %v1328_v6 = vpop.eup %1327 }
 0x419   : > { %v929_v7 = vmul.f32 %v1328_v6, %v928_v5 }
 0x41b   : > { %935 = vperm.xlu1 %1326, %v929_v7   ;;  %v931_v9 = vmul.f32 %v929_v7, %v820_v36 }
 0x41d   : > { %v932_v10 = vsub.f32 %v930_v8, %v931_v9 }
 0x41f   : > { %942 = vperm.xlu1 %1326, %v932_v10  }
 0x49a   : > { %v936_v11 = vpop.permute.xlu1 %935 }
 0x49b   : > { %v938_v14 = vmul.f32 %v936_v11, %v1545_v12  ;;  %v939_v0 = vmul.f32 %v936_v11, %v1547_v13  ;;  %v949_v17 = vmul.f32 %v936_v11, %v1549_v50  ;;  %v950_v18 = vmul.f32 %v936_v11, %v1551_v15 }
 0x49c   : > { %v957_v19 = vmul.f32 %v936_v11, %v1559_v16  ;;  %v958_v20 = vmul.f32 %v936_v11, %v1567_v22  ;;  %v965_v23 = vmul.f32 %v936_v11, %v1565_v21  ;;  %v966_v24 = vmul.f32 %v936_v11, %v1571_v25 }
 0x49e   : > { %v943_v26 = vpop.permute.xlu1 %942 }
 0x49f   : > { %v945_v27 = vadd.f32 %v943_v26, %v938_v14  ;;  %v946_v28 = vadd.f32 %v943_v26, %v939_v0  ;;  %v951_v29 = vadd.f32 %v949_v17, %v943_v26  ;;  %v952_v12 = vadd.f32 %v950_v18, %v943_v26 }
 0x4a0   : > { %v959_v30 = vadd.f32 %v957_v19, %v943_v26  ;;  %v960_v13 = vadd.f32 %v958_v20, %v943_v26  ;;  %v967_v31 = vadd.f32 %v965_v23, %v943_v26  ;;  %v968_v50 = vadd.f32 %v966_v24, %v943_v26 }
 0x4a1   : > { %v947_v32 = vmax.f32 %v945_v27, 0.0  ;;  %v948_v15 = vmax.f32 %v946_v28, 0.0  ;;  %v953_v33 = vmax.f32 %v951_v29, 0.0  ;;  %v954_v16 = vmax.f32 %v952_v12, 0.0 }
 0x4a2   : > { %v961_v35 = vmax.f32 %v959_v30, 0.0  ;;  %v962_v21 = vmax.f32 %v960_v13, 0.0  ;;  %v969_v37 = vmax.f32 %v967_v31, 0.0  ;;  %v970_v38 = vmax.f32 %v968_v50, 0.0 }
 0x4a3   : > { %v955_v22 = vmax.f32 %v947_v32, %v953_v33  ;;  %v956_v34 = vmax.f32 %v948_v15, %v954_v16 }
 0x4a5   : > { %v963_v36 = vmax.f32 %v955_v22, %v961_v35  ;;  %v964_v25 = vmax.f32 %v956_v34, %v962_v21 }
 0x4a7   : > { %v971_v39 = vmax.f32 %v963_v36, %v969_v37  ;;  %v972_v40 = vmax.f32 %v964_v25, %v970_v38 }
 0x4a9   : > { %973 = vst [vmem:[%s291_s26] sm:$0x3f] %v971_v39  ;;  %974 = vst.msk [vmem:[%s291_s26 + $0x8] sm:$0x3f] %vm403_vm0, %v972_v40 }
 0x4aa PF: > { %s18_s24 = sadd.s32 1, %s1335_s24  }
 0x4ab   : > { %p15_p4 = scmp.ge.s32.totalorder %s18_s24, 4  }
 0x4ad   :  { %17 = sbr.rel (!%p15_p4) target bundleno = 1 (0x1), region = 92 }

// kernel: forward.4
= control target key start
LH: loop header
LB: loop body
LE: loop exit
PB: predicated region body
PF: predicated region fallthrough
CT: control target
= control target key end

     0   :  { %s1604_s24 = smov 0   ;;  %s1895_s0 = inlined_call_operand.vmem [shape: f32[2,4,256,25], index: 0, kind: input, shape index: {}]   ;;  %s1896_s1 = inlined_call_operand.vmem [shape: f32[16,256], index: 1, kind: input, shape index: {}]   ;;  %s1897_s2 = inlined_call_operand.vmem [shape: f32[16,1], index: 2, kind: input, shape index: {}]   ;;  %s1898_s3 = inlined_call_operand.vmem [shape: f32[16,1], index: 3, kind: input, shape index: {}]   ;;  %s1899_s4 = inlined_call_operand.vmem [shape: f32[16,1], index: 4, kind: input, shape index: {}]   ;;  %s1900_s5 = inlined_call_operand.vmem [shape: f32[16,16], index: 5, kind: input, shape index: {}]   ;;  %s1901_s6 = inlined_call_operand.vmem [shape: f32[2,4,16,25], index: 6, kind: output, shape index: {0}]   ;;  %s1902_s7 = inlined_call_operand.vmem [shape: f32[2,16,25], index: 7, kind: output, shape index: {1}]  }
   0x1 LB: > { %s1108_s25 = sadd.s32 4294967295, %s1561_s24   ;;  %p1112_p0 = scmp.ge.s32.totalorder %s1561_s24, 1  ;;  %s1561_s24 = sphi %s1604_s24, %s18_s24  }
   0x2   : > { %p240_p1 = scmp.lt.s32.totalorder %s1561_s24, 3 }
   0x4   : > { %p241_p2 = pnand %p1112_p0, %p240_p1 }
   0x5   : > { %p277_p3 = scmp.lt.s32.totalorder (!%p241_p2), %s1108_s25, 1  ;;  %v1615_v0 = vld [vmem:[%s1896_s1 + $0x8] sm:$0xff] (!%p241_p2)  ;;  %v296_v1 = vld [vmem:[%s1897_s2] sm:$0xff] (!%p241_p2)  ;;  %v1563_v2 = vmov (!%p241_p2), 0   ;;  %vm759_vm0 = vcmask (!%p241_p2), 130048   ;;  %vm415_vm1 = vcmask (!%p241_p2), 203776  }
   0x6   : > { %244 = sbr.rel (%p241_p2) target bundleno = 1216 (0x4c0), region = 44  ;;  %404 = vmatprep.mubr.f32.mxu0 (!%p241_p2), %v1615_v0  ;;  %515 = vmatprep.mubr.f32.mxu1 (!%p241_p2), %v1615_v0  ;;  %v297_v3 = vld [vmem:[%s1897_s2 + $0x8] sm:$0xff] (!%p241_p2) }
   0x7   : > { %1549 = vset.pattern.permute.xlu0 (!%p241_p2), %v1563_v2  ;;  %1550 = vset.pattern.permute.xlu1 (!%p241_p2), %v1563_v2 }
   0x8   : > { %332 = vperm.xlu0 (!%p241_p2), %1549, %v296_v1  }
   0xc   : > { %337 = vperm.xlu0 (!%p241_p2), %1549, %v297_v3  }
   0xd   : > { %s1904_s25 = smov (!%p277_p3, %s1108_s25), 1 }
   0xe   : > { %s1227_s30 = sshll.u32 %s1904_s25, 10  ;;  %s1228_s21 = sshll.u32 %s1904_s25, 6 }
   0xf   : > { %s1631_s12 = scalar_lea.vmem %s1895_s0, %s1227_s30  ;;  %s1799_s26 = scalar_lea.vmem %s1901_s6, %s1228_s21 }
  0x10   : > { %v314_v4 = vld [vmem:[%s1631_s12 + $0x80] sm:$0xff]  ;;  %v315_v5 = vld [vmem:[%s1631_s12 + $0x88] sm:$0xff]  ;;  %v316_v15 = vld [vmem:[%s1631_s12 + $0x90] sm:$0xff]  ;;  %s1229_s14 = sshll.u32 %s1904_s25, 4 }
  0x11   : > { %v1135_v6 = vld [vmem:[%s1631_s12 + $0x180] sm:$0xff]  ;;  %v1404_v7 = vpack.c.bf16 %v315_v5, %v314_v4  ;;  %v1136_v8 = vld [vmem:[%s1631_s12 + $0x188] sm:$0xff]  ;;  %v317_v17 = vld [vmem:[%s1631_s12 + $0x98] sm:$0xff]  ;;  %s291_s17 = scalar_lea.vmem %s1902_s7, %s1229_s14 }
  0x12   : > { %v298_v9 = vld [vmem:[%s1631_s12] sm:$0xff]  ;;  %v299_v10 = vld [vmem:[%s1631_s12 + $0x8] sm:$0xff]  ;;  %v1436_v11 = vpack.c.bf16 %v1136_v8, %v1135_v6  ;;  %v1137_v18 = vld [vmem:[%s1631_s12 + $0x190] sm:$0xff]  ;;  %v1408_v20 = vpack.c.bf16 %v317_v17, %v316_v15 }
  0x13   : > { %v1406_v12 = vpack.c.bf16 %v299_v10, %v298_v9  ;;  %v1119_v13 = vld [vmem:[%s1631_s12 + $0x100] sm:$0xff]  ;;  %v1120_v14 = vld [vmem:[%s1631_s12 + $0x108] sm:$0xff]  ;;  %1405 = vmatprep.subr.bf16.mxu0 %v1404_v7  ;;  %v1138_v19 = vld [vmem:[%s1631_s12 + $0x198] sm:$0xff] }
  0x14   : > { %v1438_v16 = vpack.c.bf16 %v1120_v14, %v1119_v13  ;;  %1437 = vmatprep.subr.bf16.mxu1 %v1436_v11  ;;  %v1440_v21 = vpack.c.bf16 %v1138_v19, %v1137_v18  ;;  %v300_v22 = vld [vmem:[%s1631_s12 + $0x10] sm:$0xff]  ;;  %v301_v23 = vld [vmem:[%s1631_s12 + $0x18] sm:$0xff]  ;;  %v318_v27 = vld [vmem:[%s1631_s12 + $0xa0] sm:$0xff] }
  0x15   : > { %1407 = vmatpush3.bf16.msra.mxu0 %v1406_v12  ;;  %v1121_v24 = vld [vmem:[%s1631_s12 + $0x110] sm:$0xff]  ;;  %v1410_v25 = vpack.c.bf16 %v301_v23, %v300_v22  ;;  %v1122_v26 = vld [vmem:[%s1631_s12 + $0x118] sm:$0xff]  ;;  %v319_v28 = vld [vmem:[%s1631_s12 + $0xa8] sm:$0xff] }
  0x16   : > { %1439 = vmatpush3.bf16.msra.mxu1 %v1438_v16  ;;  %1409 = vmatprep.subr.bf16.mxu0 %v1408_v20  ;;  %v1442_v29 = vpack.c.bf16 %v1122_v26, %v1121_v24  ;;  %v1412_v30 = vpack.c.bf16 %v319_v28, %v318_v27  ;;  %v1139_v31 = vld [vmem:[%s1631_s12 + $0x1a0] sm:$0xff]  ;;  %v1140_v32 = vld [vmem:[%s1631_s12 + $0x1a8] sm:$0xff]  ;;  %v320_v39 = vld [vmem:[%s1631_s12 + $0xb0] sm:$0xff] }
  0x17   : > { %1441 = vmatprep.subr.bf16.mxu1 %v1440_v21  ;;  %v302_v33 = vld [vmem:[%s1631_s12 + $0x20] sm:$0xff]  ;;  %v1444_v34 = vpack.c.bf16 %v1140_v32, %v1139_v31  ;;  %v303_v35 = vld [vmem:[%s1631_s12 + $0x28] sm:$0xff]  ;;  %v321_v40 = vld [vmem:[%s1631_s12 + $0xb8] sm:$0xff] }
  0x18   : > { %v1123_v36 = vld [vmem:[%s1631_s12 + $0x120] sm:$0xff]  ;;  %v1124_v37 = vld [vmem:[%s1631_s12 + $0x128] sm:$0xff]  ;;  %v1414_v38 = vpack.c.bf16 %v303_v35, %v302_v33  ;;  %v1141_v41 = vld [vmem:[%s1631_s12 + $0x1b0] sm:$0xff]  ;;  %v1416_v43 = vpack.c.bf16 %v321_v40, %v320_v39 }
  0x19   : > { %1411 = vmatpush3.bf16.msra.mxu0 %v1410_v25  ;;  %v1446_v42 = vpack.c.bf16 %v1124_v37, %v1123_v36  ;;  %v1142_v44 = vld [vmem:[%s1631_s12 + $0x1b8] sm:$0xff]  ;;  %v304_v45 = vld [vmem:[%s1631_s12 + $0x30] sm:$0xff]  ;;  %v322_v50 = vld [vmem:[%s1631_s12 + $0xc0] sm:$0xff] }
  0x1a   : > { %1443 = vmatpush3.bf16.msra.mxu1 %v1442_v29  ;;  %1413 = vmatprep.subr.bf16.mxu0 %v1412_v30  ;;  %v305_v46 = vld [vmem:[%s1631_s12 + $0x38] sm:$0xff]  ;;  %v1448_v47 = vpack.c.bf16 %v1142_v44, %v1141_v41  ;;  %v1125_v48 = vld [vmem:[%s1631_s12 + $0x130] sm:$0xff]  ;;  %v323_v51 = vld [vmem:[%s1631_s12 + $0xc8] sm:$0xff] }
  0x1b   : > { %1445 = vmatprep.subr.bf16.mxu1 %v1444_v34  ;;  %v1126_v49 = vld [vmem:[%s1631_s12 + $0x138] sm:$0xff]  ;;  %v1143_v52 = vld [vmem:[%s1631_s12 + $0x1c0] sm:$0xff]  ;;  %v1144_v53 = vld [vmem:[%s1631_s12 + $0x1c8] sm:$0xff]  ;;  %v1418_v54 = vpack.c.bf16 %v305_v46, %v304_v45  ;;  %v1420_v56 = vpack.c.bf16 %v323_v51, %v322_v50 }
  0x1c   : > { %v1450_v55 = vpack.c.bf16 %v1126_v49, %v1125_v48  ;;  %v306_v57 = vld [vmem:[%s1631_s12 + $0x40] sm:$0xff]  ;;  %v307_v58 = vld [vmem:[%s1631_s12 + $0x48] sm:$0xff]  ;;  %v1452_v60 = vpack.c.bf16 %v1144_v53, %v1143_v52  ;;  %v324_v62 = vld [vmem:[%s1631_s12 + $0xd0] sm:$0xff] }
  0x1d   : > { %1415 = vmatpush3.bf16.msra.mxu0 %v1414_v38  ;;  %v1127_v59 = vld [vmem:[%s1631_s12 + $0x140] sm:$0xff]  ;;  %v1128_v61 = vld [vmem:[%s1631_s12 + $0x148] sm:$0xff]  ;;  %v325_v63 = vld [vmem:[%s1631_s12 + $0xd8] sm:$0xff]  ;;  %v1422_v3 = vpack.c.bf16 %v307_v58, %v306_v57 }
  0x1e   : > { %1447 = vmatpush3.bf16.msra.mxu1 %v1446_v42  ;;  %1417 = vmatprep.subr.bf16.mxu0 %v1416_v43  ;;  %v1145_v1 = vld [vmem:[%s1631_s12 + $0x1d0] sm:$0xff]  ;;  %v1146_v2 = vld [vmem:[%s1631_s12 + $0x1d8] sm:$0xff]  ;;  %v1454_v4 = vpack.c.bf16 %v1128_v61, %v1127_v59  ;;  %v1424_v5 = vpack.c.bf16 %v325_v63, %v324_v62  ;;  %v326_v11 = vld [vmem:[%s1631_s12 + $0xe0] sm:$0xff] }
  0x1f   : > { %1449 = vmatprep.subr.bf16.mxu1 %v1448_v47  ;;  %v308_v6 = vld [vmem:[%s1631_s12 + $0x50] sm:$0xff]  ;;  %v309_v7 = vld [vmem:[%s1631_s12 + $0x58] sm:$0xff]  ;;  %v1456_v9 = vpack.c.bf16 %v1146_v2, %v1145_v1  ;;  %v327_v12 = vld [vmem:[%s1631_s12 + $0xe8] sm:$0xff] }
  0x20   : > { %v1129_v8 = vld [vmem:[%s1631_s12 + $0x150] sm:$0xff]  ;;  %v1130_v10 = vld [vmem:[%s1631_s12 + $0x158] sm:$0xff]  ;;  %v1147_v13 = vld [vmem:[%s1631_s12 + $0x1e0] sm:$0xff]  ;;  %v1426_v15 = vpack.c.bf16 %v309_v7, %v308_v6  ;;  %v1428_v17 = vpack.c.bf16 %v327_v12, %v326_v11 }
  0x21   : > { %1419 = vmatpush3.bf16.msra.mxu0 %v1418_v54  ;;  %v1148_v14 = vld [vmem:[%s1631_s12 + $0x1e8] sm:$0xff]  ;;  %v1458_v16 = vpack.c.bf16 %v1130_v10, %v1129_v8  ;;  %v310_v18 = vld [vmem:[%s1631_s12 + $0x60] sm:$0xff]  ;;  %v328_v23 = vld [vmem:[%s1631_s12 + $0xf0] sm:$0xff] }
  0x22   : > { %1451 = vmatpush3.bf16.msra.mxu1 %v1450_v55  ;;  %1421 = vmatprep.subr.bf16.mxu0 %v1420_v56  ;;  %v311_v19 = vld [vmem:[%s1631_s12 + $0x68] sm:$0xff]  ;;  %v1131_v20 = vld [vmem:[%s1631_s12 + $0x160] sm:$0xff]  ;;  %v1460_v21 = vpack.c.bf16 %v1148_v14, %v1147_v13  ;;  %v329_v24 = vld [vmem:[%s1631_s12 + $0xf8] sm:$0xff] }
  0x23   : > { %1453 = vmatprep.subr.bf16.mxu1 %v1452_v60  ;;  %v1132_v22 = vld [vmem:[%s1631_s12 + $0x168] sm:$0xff]  ;;  %v1149_v25 = vld [vmem:[%s1631_s12 + $0x1f0] sm:$0xff]  ;;  %v1150_v26 = vld [vmem:[%s1631_s12 + $0x1f8] sm:$0xff]  ;;  %v1430_v27 = vpack.c.bf16 %v311_v19, %v310_v18  ;;  %v1432_v29 = vpack.c.bf16 %v329_v24, %v328_v23 }
  0x24   : > { %v1462_v28 = vpack.c.bf16 %v1132_v22, %v1131_v20  ;;  %v312_v30 = vld [vmem:[%s1631_s12 + $0x70] sm:$0xff]  ;;  %v313_v31 = vld [vmem:[%s1631_s12 + $0x78] sm:$0xff]  ;;  %v1464_v33 = vpack.c.bf16 %v1150_v26, %v1149_v25  ;;  %v1169_v35 = vld [vmem:[%s1631_s12 + $0x280] sm:$0xff] }
  0x25   : > { %1423 = vmatpush3.bf16.msra.mxu0 %v1422_v3  ;;  %v1133_v32 = vld [vmem:[%s1631_s12 + $0x170] sm:$0xff]  ;;  %v1134_v34 = vld [vmem:[%s1631_s12 + $0x178] sm:$0xff]  ;;  %v1170_v36 = vld [vmem:[%s1631_s12 + $0x288] sm:$0xff]  ;;  %v1434_v39 = vpack.c.bf16 %v313_v31, %v312_v30 }
  0x26   : > { %1455 = vmatpush3.bf16.msra.mxu1 %v1454_v4  ;;  %1425 = vmatprep.subr.bf16.mxu0 %v1424_v5  ;;  %v1203_v37 = vld [vmem:[%s1631_s12 + $0x380] sm:$0xff]  ;;  %v1204_v38 = vld [vmem:[%s1631_s12 + $0x388] sm:$0xff]  ;;  %v1466_v40 = vpack.c.bf16 %v1134_v34, %v1133_v32  ;;  %v1468_v41 = vpack.c.bf16 %v1170_v36, %v1169_v35  ;;  %v1171_v47 = vld [vmem:[%s1631_s12 + $0x290] sm:$0xff] }
  0x27   : > { %1457 = vmatprep.subr.bf16.mxu1 %v1456_v9  ;;  %v1153_v42 = vld [vmem:[%s1631_s12 + $0x200] sm:$0xff]  ;;  %v1154_v43 = vld [vmem:[%s1631_s12 + $0x208] sm:$0xff]  ;;  %v1500_v45 = vpack.c.bf16 %v1204_v38, %v1203_v37  ;;  %v1172_v48 = vld [vmem:[%s1631_s12 + $0x298] sm:$0xff] }
  0x28   : > { %v1187_v44 = vld [vmem:[%s1631_s12 + $0x300] sm:$0xff]  ;;  %v1188_v46 = vld [vmem:[%s1631_s12 + $0x308] sm:$0xff]  ;;  %v1205_v49 = vld [vmem:[%s1631_s12 + $0x390] sm:$0xff]  ;;  %v1470_v52 = vpack.c.bf16 %v1154_v43, %v1153_v42  ;;  %v1472_v54 = vpack.c.bf16 %v1172_v48, %v1171_v47 }
  0x29   : > { %1427 = vmatpush3.bf16.msra.mxu0 %v1426_v15  ;;  %v1206_v50 = vld [vmem:[%s1631_s12 + $0x398] sm:$0xff]  ;;  %v1712_v51 = vld [vmem:[%s1896_s1] sm:$0xff]  ;;  %v1502_v53 = vpack.c.bf16 %v1188_v46, %v1187_v44  ;;  %v1155_v55 = vld [vmem:[%s1631_s12 + $0x210] sm:$0xff] }
  0x2a   : > { %1459 = vmatpush3.bf16.msra.mxu1 %v1458_v16  ;;  %1429 = vmatprep.subr.bf16.mxu0 %v1428_v17  ;;  %v1156_v56 = vld [vmem:[%s1631_s12 + $0x218] sm:$0xff]  ;;  %v1189_v57 = vld [vmem:[%s1631_s12 + $0x310] sm:$0xff]  ;;  %v1504_v58 = vpack.c.bf16 %v1206_v50, %v1205_v49  ;;  %v1173_v60 = vld [vmem:[%s1631_s12 + $0x2a0] sm:$0xff] }
  0x2b   : > { %1461 = vmatprep.subr.bf16.mxu1 %v1460_v21  ;;  %v1190_v59 = vld [vmem:[%s1631_s12 + $0x318] sm:$0xff]  ;;  %v1174_v61 = vld [vmem:[%s1631_s12 + $0x2a8] sm:$0xff]  ;;  %v1207_v62 = vld [vmem:[%s1631_s12 + $0x3a0] sm:$0xff]  ;;  %v1474_v2 = vpack.c.bf16 %v1156_v56, %v1155_v55 }
  0x2c   : > { %v1208_v63 = vld [vmem:[%s1631_s12 + $0x3a8] sm:$0xff]  ;;  %v1726_v1 = vld [vmem:[%s1896_s1 + $0x18] sm:$0xff]  ;;  %v1732_v3 = vld [vmem:[%s1896_s1 + $0x10] sm:$0xff]  ;;  %v1506_v4 = vpack.c.bf16 %v1190_v59, %v1189_v57  ;;  %v1476_v5 = vpack.c.bf16 %v1174_v61, %v1173_v60 }
  0x2d   : > { %1431 = vmatpush3.bf16.msra.mxu0 %v1430_v27  ;;  %v1157_v6 = vld [vmem:[%s1631_s12 + $0x220] sm:$0xff]  ;;  %v1158_v7 = vld [vmem:[%s1631_s12 + $0x228] sm:$0xff]  ;;  %v1508_v9 = vpack.c.bf16 %v1208_v63, %v1207_v62  ;;  %v1175_v11 = vld [vmem:[%s1631_s12 + $0x2b0] sm:$0xff] }
  0x2e   : > { %1463 = vmatpush3.bf16.msra.mxu1 %v1462_v28  ;;  %1433 = vmatprep.subr.bf16.mxu0 %v1432_v29  ;;  %v1191_v8 = vld [vmem:[%s1631_s12 + $0x320] sm:$0xff]  ;;  %v1192_v10 = vld [vmem:[%s1631_s12 + $0x328] sm:$0xff]  ;;  %v1176_v12 = vld [vmem:[%s1631_s12 + $0x2b8] sm:$0xff]  ;;  %v1478_v15 = vpack.c.bf16 %v1158_v7, %v1157_v6 }
  0x2f   : > { %1465 = vmatprep.subr.bf16.mxu1 %v1464_v33  ;;  %v1209_v13 = vld [vmem:[%s1631_s12 + $0x3b0] sm:$0xff]  ;;  %v1210_v14 = vld [vmem:[%s1631_s12 + $0x3b8] sm:$0xff]  ;;  %v1510_v16 = vpack.c.bf16 %v1192_v10, %v1191_v8  ;;  %v1480_v17 = vpack.c.bf16 %v1176_v12, %v1175_v11  ;;  %v1177_v23 = vld [vmem:[%s1631_s12 + $0x2c0] sm:$0xff] }
  0x30   : > { %v1159_v18 = vld [vmem:[%s1631_s12 + $0x230] sm:$0xff]  ;;  %v1160_v19 = vld [vmem:[%s1631_s12 + $0x238] sm:$0xff]  ;;  %v1512_v21 = vpack.c.bf16 %v1210_v14, %v1209_v13  ;;  %v1178_v24 = vld [vmem:[%s1631_s12 + $0x2c8] sm:$0xff] }
  0x31   : > { %1435 = vmatpush3.bf16.msra.mxu0 %v1434_v39  ;;  %v1193_v20 = vld [vmem:[%s1631_s12 + $0x330] sm:$0xff]  ;;  %v1194_v22 = vld [vmem:[%s1631_s12 + $0x338] sm:$0xff]  ;;  %v1211_v25 = vld [vmem:[%s1631_s12 + $0x3c0] sm:$0xff]  ;;  %v1482_v27 = vpack.c.bf16 %v1160_v19, %v1159_v18  ;;  %v1484_v29 = vpack.c.bf16 %v1178_v24, %v1177_v23 }
  0x32   : > { %1467 = vmatpush3.bf16.msra.mxu1 %v1466_v40  ;;  %1469 = vmatprep.subr.bf16.mxu0 %v1468_v41  ;;  %v1212_v26 = vld [vmem:[%s1631_s12 + $0x3c8] sm:$0xff]  ;;  %v1514_v28 = vpack.c.bf16 %v1194_v22, %v1193_v20  ;;  %v1161_v30 = vld [vmem:[%s1631_s12 + $0x240] sm:$0xff]  ;;  %v1179_v35 = vld [vmem:[%s1631_s12 + $0x2d0] sm:$0xff] }
  0x33   : > { %1501 = vmatprep.subr.bf16.mxu1 %v1500_v45  ;;  %v1162_v31 = vld [vmem:[%s1631_s12 + $0x248] sm:$0xff]  ;;  %v1195_v32 = vld [vmem:[%s1631_s12 + $0x340] sm:$0xff]  ;;  %v1516_v33 = vpack.c.bf16 %v1212_v26, %v1211_v25  ;;  %v1213_v36 = vld [vmem:[%s1631_s12 + $0x3d0] sm:$0xff] }
  0x34   : > { %405 = vmatmul.mubr.f32.vlgmr.msra.gmra.mrb[0].mxu0 %v1712_v51  ;;  %v1196_v34 = vld [vmem:[%s1631_s12 + $0x348] sm:$0xff]  ;;  %v1214_v37 = vld [vmem:[%s1631_s12 + $0x3d8] sm:$0xff]  ;;  %v1486_v38 = vpack.c.bf16 %v1162_v31, %v1161_v30  ;;  %v1163_v41 = vld [vmem:[%s1631_s12 + $0x250] sm:$0xff] }
  0x35   : > { %516 = vmatmul.mubr.f32.vlgmr.msra.gmra.mrb[0].mxu1 %v1712_v51  ;;  %1471 = vmatpush3.bf16.msra.mxu0 %v1470_v52  ;;  %v1518_v39 = vpack.c.bf16 %v1196_v34, %v1195_v32  ;;  %v1164_v42 = vld [vmem:[%s1631_s12 + $0x258] sm:$0xff]  ;;  %v1197_v43 = vld [vmem:[%s1631_s12 + $0x350] sm:$0xff]  ;;  %v1520_v44 = vpack.c.bf16 %v1214_v37, %v1213_v36  ;;  %v1181_v46 = vld [vmem:[%s1631_s12 + $0x2e0] sm:$0xff] }
  0x36   : > { %1503 = vmatpush3.bf16.msra.mxu1 %v1502_v53  ;;  %1473 = vmatprep.subr.bf16.mxu0 %v1472_v54  ;;  %v1198_v45 = vld [vmem:[%s1631_s12 + $0x358] sm:$0xff]  ;;  %v1182_v47 = vld [vmem:[%s1631_s12 + $0x2e8] sm:$0xff]  ;;  %v1215_v48 = vld [vmem:[%s1631_s12 + $0x3e0] sm:$0xff]  ;;  %v1490_v50 = vpack.c.bf16 %v1164_v42, %v1163_v41 }
  0x37   : > { %1505 = vmatprep.subr.bf16.mxu1 %v1504_v58  ;;  %409 = vmatprep.mubr.f32.mxu0 %v1726_v1  ;;  %v1216_v49 = vld [vmem:[%s1631_s12 + $0x3e8] sm:$0xff]  ;;  %v1522_v52 = vpack.c.bf16 %v1198_v45, %v1197_v43  ;;  %v1492_v53 = vpack.c.bf16 %v1182_v47, %v1181_v46  ;;  %v1165_v54 = vld [vmem:[%s1631_s12 + $0x260] sm:$0xff]  ;;  %v1183_v59 = vld [vmem:[%s1631_s12 + $0x2f0] sm:$0xff] }
  0x38   : > { %520 = vmatprep.mubr.f32.mxu1 %v1726_v1  ;;  %410 = vmatmul.mubr.f32.gmra.mrb[2].mxu0 %v1732_v3  ;;  %v1166_v55 = vld [vmem:[%s1631_s12 + $0x268] sm:$0xff]  ;;  %v1199_v56 = vld [vmem:[%s1631_s12 + $0x360] sm:$0xff]  ;;  %v1524_v57 = vpack.c.bf16 %v1216_v49, %v1215_v48  ;;  %v1184_v60 = vld [vmem:[%s1631_s12 + $0x2f8] sm:$0xff] }
  0x39   : > { %1475 = vmatpush3.bf16.msra.mxu0 %v1474_v2  ;;  %521 = vmatmul.mubr.f32.gmra.mrb[2].mxu1 %v1732_v3  ;;  %v1200_v58 = vld [vmem:[%s1631_s12 + $0x368] sm:$0xff]  ;;  %v1217_v61 = vld [vmem:[%s1631_s12 + $0x3f0] sm:$0xff]  ;;  %v1218_v62 = vld [vmem:[%s1631_s12 + $0x3f8] sm:$0xff]  ;;  %v1494_v63 = vpack.c.bf16 %v1166_v55, %v1165_v54 }
  0x3a   : > { %1507 = vmatpush3.bf16.msra.mxu1 %v1506_v4  ;;  %1477 = vmatprep.subr.bf16.mxu0 %v1476_v5  ;;  %v1526_v2 = vpack.c.bf16 %v1200_v58, %v1199_v56  ;;  %v1496_v4 = vpack.c.bf16 %v1184_v60, %v1183_v59  ;;  %v1167_v5 = vld [vmem:[%s1631_s12 + $0x270] sm:$0xff]  ;;  %v1168_v6 = vld [vmem:[%s1631_s12 + $0x278] sm:$0xff]  ;;  %v1528_v7 = vpack.c.bf16 %v1218_v62, %v1217_v61  ;;  %v757_v12 = vld [vmem:[%s1900_s5] sm:$0xff] }
  0x3b   : > { %1509 = vmatprep.subr.bf16.mxu1 %v1508_v9  ;;  %626 = vmatprep.mubr.f32.mxu0 %v1615_v0  ;;  %v1201_v8 = vld [vmem:[%s1631_s12 + $0x370] sm:$0xff]  ;;  %v1202_v9 = vld [vmem:[%s1631_s12 + $0x378] sm:$0xff]  ;;  %v1498_v10 = vpack.c.bf16 %v1168_v6, %v1167_v5 }
  0x3c   : > { %737 = vmatprep.mubr.f32.mxu1 %v1615_v0  ;;  %v1180_v0 = vld [vmem:[%s1631_s12 + $0x2d8] sm:$0xff]  ;;  %v1530_v11 = vpack.c.bf16 %v1202_v9, %v1201_v8 }
  0x3d   : > { %1479 = vmatpush3.bf16.msra.mxu0 %v1478_v15  ;;  %v1488_v40 = vpack.c.bf16 %v1180_v0, %v1179_v35 }
  0x3e   : > { %1511 = vmatpush3.bf16.msra.mxu1 %v1510_v16  ;;  %1481 = vmatprep.subr.bf16.mxu0 %v1480_v17 }
  0x3f   : > { %1513 = vmatprep.subr.bf16.mxu1 %v1512_v21 }
  0x41   : > { %1483 = vmatpush3.bf16.msra.mxu0 %v1482_v27 }
  0x42   : > { %1515 = vmatpush3.bf16.msra.mxu1 %v1514_v28  ;;  %1485 = vmatprep.subr.bf16.mxu0 %v1484_v29 }
  0x43   : > { %1517 = vmatprep.subr.bf16.mxu1 %v1516_v33 }
  0x45   : > { %1487 = vmatpush3.bf16.msra.mxu0 %v1486_v38 }
  0x46   : > { %1519 = vmatpush3.bf16.msra.mxu1 %v1518_v39  ;;  %1489 = vmatprep.subr.bf16.mxu0 %v1488_v40 }
  0x47   : > { %1521 = vmatprep.subr.bf16.mxu1 %v1520_v44 }
  0x49   : > { %1491 = vmatpush3.bf16.msra.mxu0 %v1490_v50  ;;  %v758_v50 = vld [vmem:[%s1900_s5 + $0x8] sm:$0xff] }
  0x4a   : > { %1523 = vmatpush3.bf16.msra.mxu1 %v1522_v52  ;;  %1493 = vmatprep.subr.bf16.mxu0 %v1492_v53 }
  0x4b   : > { %1525 = vmatprep.subr.bf16.mxu1 %v1524_v57 }
  0x4d   : > { %1495 = vmatpush3.bf16.msra.mxu0 %v1494_v63 }
  0x4e   : > { %1527 = vmatpush3.bf16.msra.mxu1 %v1526_v2  ;;  %1497 = vmatprep.subr.bf16.mxu0 %v1496_v4 }
  0x4f   : > { %1529 = vmatprep.subr.bf16.mxu1 %v1528_v7 }
  0x51   : > { %1499 = vmatpush3.bf16.msra.mxu0 %v1498_v10 }
  0x52   : > { %1531 = vmatpush3.bf16.msra.mxu1 %v1530_v11 }
  0x54   : > { %627 = vmatmul.mubr.f32.vlgmr.msra.gmra.mrb[4].mxu0 %v1712_v51 }
  0x55   : > { %738 = vmatmul.mubr.f32.vlgmr.msra.gmra.mrb[4].mxu1 %v1712_v51  ;;  %631 = vmatprep.mubr.f32.mxu0 %v1726_v1 }
  0x56   : > { %742 = vmatprep.mubr.f32.mxu1 %v1726_v1 }
  0x58   : > { %632 = vmatmul.mubr.f32.gmra.mrb[6].mxu0 %v1732_v3 }
  0x59   : > { %743 = vmatmul.mubr.f32.gmra.mrb[6].mxu1 %v1732_v3  ;;  %1394 = vmatprep.mubr.msk.f32.mxu0 %vm759_vm0, %v757_v12 }
  0x5a   : > { %1401 = vmatprep.mubr.msk.f32.mxu1 %vm759_vm0, %v757_v12 }
  0x87   : > { %v333_v14 = vpop.permute.xlu0 %332 }
  0x8b   : > { %v338_v19 = vpop.permute.xlu0 %337 }
 0x107   : > { %v1262_v13 = vpop.f32.mrb[0].mxu0 }
 0x108   : > { %v1300_v51 = vpop.f32.mrb[0].mxu1  ;;  %v1263_v15 = vpop.f32.mrb[1].mxu0 }
 0x109   : > { %v1264_v16 = vadd.f32 %v1263_v15, %v1262_v13  ;;  %v1301_v1 = vpop.f32.mrb[1].mxu1 }
 0x10a   : > { %v1302_v17 = vadd.f32 %v1301_v1, %v1300_v51 }
 0x10b   : > { %v1801_v3 = vadd.f32 %v1264_v16, %v333_v14  ;;  %v1265_v18 = vpop.f32.mrb[2].mxu0 }
 0x10c   : > { %v1803_v20 = vadd.f32 %v1302_v17, %v333_v14  ;;  %v1303_v21 = vpop.f32.mrb[2].mxu1  ;;  %v1266_v22 = vpop.f32.mrb[3].mxu0 }
 0x10d   : > { %416 = vst.msk [vmem:[%s1799_s26] sm:$0xff] %vm415_vm1, %v1801_v3  ;;  %v1267_v23 = vadd.f32 %v1266_v22, %v1265_v18  ;;  %v1304_v24 = vpop.f32.mrb[3].mxu1 }
 0x10e   : > { %1151 = vst.msk [vmem:[%s1799_s26 + $0x10] sm:$0xff] %vm415_vm1, %v1803_v20  ;;  %v1305_v25 = vadd.f32 %v1304_v24, %v1303_v21  ;;  %v751_v40 = vadd.f32 %v1803_v20, %v1801_v3 }
 0x10f   : > { %v1811_v26 = vadd.f32 %v1267_v23, %v338_v19 }
 0x110   : > { %v1813_v27 = vadd.f32 %v1305_v25, %v338_v19 }
 0x111   : > { %417 = vst.msk [vmem:[%s1799_s26 + $0x8] sm:$0xff] %vm415_vm1, %v1811_v26 }
 0x112   : > { %1152 = vst.msk [vmem:[%s1799_s26 + $0x18] sm:$0xff] %vm415_vm1, %v1813_v27  ;;  %v752_v43 = vadd.f32 %v1813_v27, %v1811_v26 }
 0x127   : > { %v1338_v28 = vpop.f32.mrb[4].mxu0 }
 0x128   : > { %v1376_v29 = vpop.f32.mrb[4].mxu1  ;;  %v1339_v30 = vpop.f32.mrb[5].mxu0 }
 0x129   : > { %v1340_v31 = vadd.f32 %v1339_v30, %v1338_v28  ;;  %v1377_v32 = vpop.f32.mrb[5].mxu1 }
 0x12a   : > { %v1378_v33 = vadd.f32 %v1377_v32, %v1376_v29 }
 0x12b   : > { %v1821_v34 = vadd.f32 %v1340_v31, %v333_v14  ;;  %v1341_v35 = vpop.f32.mrb[6].mxu0 }
 0x12c   : > { %v1823_v0 = vadd.f32 %v1378_v33, %v333_v14  ;;  %v1379_v36 = vpop.f32.mrb[6].mxu1  ;;  %v1342_v37 = vpop.f32.mrb[7].mxu0  ;;  %v959_v33 = vld [vmem:[%s1898_s3 + $0x8] sm:$0xff] }
 0x12d   : > { %1185 = vst.msk [vmem:[%s1799_s26 + $0x20] sm:$0xff] %vm415_vm1, %v1821_v34  ;;  %v1343_v38 = vadd.f32 %v1342_v37, %v1341_v35  ;;  %v1380_v39 = vpop.f32.mrb[7].mxu1  ;;  %v753_v44 = vadd.f32 %v751_v40, %v1821_v34  ;;  %v958_v35 = vld [vmem:[%s1898_s3] sm:$0xff] }
 0x12e   : > { %1219 = vst.msk [vmem:[%s1799_s26 + $0x30] sm:$0xff] %vm415_vm1, %v1823_v0  ;;  %v1381_v41 = vadd.f32 %v1380_v39, %v1379_v36 }
 0x12f   : > { %v1833_v42 = vadd.f32 %v1343_v38, %v338_v19  ;;  %v755_v47 = vadd.f32 %v753_v44, %v1823_v0 }
 0x130   : > { %v1838_v45 = vadd.f32 %v1381_v41, %v338_v19  ;;  %v962_v41 = vld [vmem:[%s1899_s4] sm:$0xff] }
 0x131   : > { %1186 = vst.msk [vmem:[%s1799_s26 + $0x28] sm:$0xff] %vm415_vm1, %v1833_v42  ;;  %v754_v46 = vadd.f32 %v752_v43, %v1833_v42 }
 0x132   : > { %1220 = vst.msk [vmem:[%s1799_s26 + $0x38] sm:$0xff] %vm415_vm1, %v1838_v45 }
 0x133   : > { %v756_v48 = vadd.f32 %v754_v46, %v1838_v45  ;;  %v963_v46 = vld [vmem:[%s1899_s4 + $0x8] sm:$0xff] }
 0x135   : > { %v1532_v49 = vpack.c.bf16 %v756_v48, %v755_v47 }
 0x137   : > { %1533 = vmatprep.subr.bf16.mxu0 %v1532_v49 }
 0x138   : > { %1535 = vmatpush3.bf16.msra.mxu0 %v1532_v49 }
 0x13b   : > { %1395 = vmatmul.mubr.msk.f32.vlgmr.msra.gmra.mrb[8].mxu0 %vm759_vm0, %v758_v50 }
 0x20e   : > { %v1396_v52 = vpop.f32.mrb[8].mxu0 }
 0x20f   : > { %v832_v53 = vpop.f32.mrb[9].mxu0  ;;  %v844_v55 = vsel %vm415_vm1, %v1396_v52, 0.0 }
 0x210   : > { %v841_v54 = vsel %vm415_vm1, %v832_v53, 0.0 }
 0x211   : > { %842 = vadd.xlane.f32.xlu1 %v841_v54 }
 0x215   : > { %845 = vadd.xlane.f32.xlu1 %v844_v55 }
 0x29e   : > { %v843_v56 = vpop.xlane.xlu1 %842 }
 0x29f   : > { %v847_v57 = vmul.f32 0.01, %v843_v56 }
 0x2a1   : > { %v849_v58 = vsub.f32 %v1801_v3, %v847_v57  ;;  %v853_v59 = vsub.f32 %v1803_v20, %v847_v57  ;;  %v859_v2 = vsub.f32 %v1821_v34, %v847_v57  ;;  %v865_v8 = vsub.f32 %v1823_v0, %v847_v57 }
 0x2a2   : > { %v846_v60 = vpop.xlane.xlu1 %845 }
 0x2a3   : > { %v848_v61 = vmul.f32 0.01, %v846_v60  ;;  %v851_v62 = vmul.f32 %v849_v58, %v849_v58  ;;  %v855_v63 = vmul.f32 %v853_v59, %v853_v59  ;;  %v861_v11 = vmul.f32 %v859_v2, %v859_v2 }
 0x2a4   : > { %v867_v16 = vmul.f32 %v865_v8, %v865_v8 }
 0x2a5   : > { %v850_v4 = vsub.f32 %v1811_v26, %v848_v61  ;;  %v854_v5 = vsub.f32 %v1813_v27, %v848_v61  ;;  %v857_v6 = vadd.f32 %v855_v63, %v851_v62  ;;  %v860_v7 = vsub.f32 %v1833_v42, %v848_v61 }
 0x2a6   : > { %v866_v12 = vsub.f32 %v1838_v45, %v848_v61 }
 0x2a7   : > { %v852_v9 = vmul.f32 %v850_v4, %v850_v4  ;;  %v856_v10 = vmul.f32 %v854_v5, %v854_v5  ;;  %v862_v14 = vmul.f32 %v860_v7, %v860_v7  ;;  %v863_v51 = vadd.f32 %v861_v11, %v857_v6 }
 0x2a8   : > { %v868_v1 = vmul.f32 %v866_v12, %v866_v12 }
 0x2a9   : > { %v858_v13 = vadd.f32 %v856_v10, %v852_v9  ;;  %v869_v17 = vadd.f32 %v867_v16, %v863_v51 }
 0x2ab   : > { %v864_v15 = vadd.f32 %v862_v14, %v858_v13 }
 0x2ad   : > { %v870_v18 = vadd.f32 %v868_v1, %v864_v15 }
 0x2af   : > { %v1536_v19 = vpack.c.bf16 %v870_v18, %v869_v17 }
 0x2b1   : > { %1537 = vmatprep.subr.bf16.mxu1 %v1536_v19 }
 0x2b2   : > { %1539 = vmatpush3.bf16.msra.mxu1 %v1536_v19 }
 0x2b5   : > { %1402 = vmatmul.mubr.msk.f32.vlgmr.msra.gmra.mrb[8].mxu1 %vm759_vm0, %v758_v50 }
 0x388   : > { %v1403_v21 = vpop.f32.mrb[8].mxu1 }
 0x389   : > { %v937_v22 = vpop.f32.mrb[9].mxu1  ;;  %v949_v23 = vsel %vm415_vm1, %v1403_v21, 0.0 }
 0x38a   : > { %950 = vadd.xlane.f32.xlu1 %v949_v23  ;;  %v946_v24 = vsel %vm415_vm1, %v937_v22, 0.0 }
 0x38b   : > { %947 = vadd.xlane.f32.xlu0 %v946_v24 }
 0x417   : > { %v951_v25 = vpop.xlane.xlu1 %950 }
 0x418   : > { %v953_v28 = vmul.f32 0.01, %v951_v25  ;;  %v948_v29 = vpop.xlane.xlu0 %947 }
 0x419   : > { %v952_v30 = vmul.f32 0.01, %v948_v29 }
 0x41a   : > { %v955_v31 = vadd.f32 1e-05, %v953_v28 }
 0x41b   : > { %v954_v32 = vadd.f32 1e-05, %v952_v30 }
 0x41c   : > { %1551 = vrsqrt.f32 %v955_v31 }
 0x41d   : > { %1553 = vrsqrt.f32 %v954_v32 }
 0x426   : > { %v1552_v36 = vpop.eup %1551 }
 0x427   : > { %v1554_v37 = vpop.eup %1553  ;;  %v961_v38 = vmul.f32 %v1552_v36, %v959_v33 }
 0x428   : > { %v960_v39 = vmul.f32 %v1554_v37, %v958_v35 }
 0x429   : > { %975 = vperm.xlu1 %1550, %v961_v38   ;;  %v965_v44 = vmul.f32 %v961_v38, %v848_v61 }
 0x42a   : > { %v964_v40 = vmul.f32 %v960_v39, %v847_v57 }
 0x42b   : > { %v967_v47 = vsub.f32 %v963_v46, %v965_v44 }
 0x42c   : > { %v966_v43 = vsub.f32 %v962_v41, %v964_v40 }
 0x42d   : > { %970 = vperm.xlu1 %1550, %v960_v39  }
 0x431   : > { %982 = vperm.xlu1 %1550, %v966_v43  }
 0x435   : > { %987 = vperm.xlu1 %1550, %v967_v47  }
 0x4a8   : > { %v976_v48 = vpop.permute.xlu1 %975 }
 0x4a9   : > { %v979_v60 = vmul.f32 %v976_v48, %v1811_v26  ;;  %v995_v63 = vmul.f32 %v976_v48, %v1813_v27 }
 0x4ac   : > { %v971_v49 = vpop.permute.xlu1 %970 }
 0x4ad   : > { %v978_v50 = vmul.f32 %v971_v49, %v1801_v3  ;;  %v994_v52 = vmul.f32 %v971_v49, %v1803_v20  ;;  %v1002_v53 = vmul.f32 %v971_v49, %v1821_v34  ;;  %v1010_v54 = vmul.f32 %v971_v49, %v1823_v0 }
 0x4ae   : > { %v1003_v3 = vmul.f32 %v976_v48, %v1833_v42  ;;  %v1011_v20 = vmul.f32 %v976_v48, %v1838_v45 }
 0x4b0   : > { %v983_v55 = vpop.permute.xlu1 %982 }
 0x4b1   : > { %v990_v56 = vadd.f32 %v983_v55, %v978_v50  ;;  %v996_v57 = vadd.f32 %v994_v52, %v983_v55  ;;  %v1004_v58 = vadd.f32 %v1002_v53, %v983_v55  ;;  %v1012_v59 = vadd.f32 %v1010_v54, %v983_v55 }
 0x4b3   : > { %v992_v61 = vmax.f32 %v990_v56, 0.0  ;;  %v998_v62 = vmax.f32 %v996_v57, 0.0  ;;  %v1006_v2 = vmax.f32 %v1004_v58, 0.0  ;;  %v1014_v7 = vmax.f32 %v1012_v59, 0.0 }
 0x4b4   : > { %v988_v4 = vpop.permute.xlu1 %987 }
 0x4b5   : > { %v1000_v34 = vmax.f32 %v992_v61, %v998_v62  ;;  %v991_v0 = vadd.f32 %v988_v4, %v979_v60  ;;  %v997_v5 = vadd.f32 %v995_v63, %v988_v4  ;;  %v1005_v6 = vadd.f32 %v1003_v3, %v988_v4 }
 0x4b6   : > { %v1013_v26 = vadd.f32 %v1011_v20, %v988_v4 }
 0x4b7   : > { %v1008_v8 = vmax.f32 %v1000_v34, %v1006_v2  ;;  %v993_v9 = vmax.f32 %v991_v0, 0.0  ;;  %v999_v10 = vmax.f32 %v997_v5, 0.0  ;;  %v1007_v11 = vmax.f32 %v1005_v6, 0.0 }
 0x4b8   : > { %v1015_v12 = vmax.f32 %v1013_v26, 0.0 }
 0x4b9   : > { %v1016_v27 = vmax.f32 %v1008_v8, %v1014_v7  ;;  %v1001_v42 = vmax.f32 %v993_v9, %v999_v10 }
 0x4bb   : > { %1018 = vst.msk [vmem:[%s291_s17] sm:$0xff] %vm415_vm1, %v1016_v27  ;;  %v1009_v45 = vmax.f32 %v1001_v42, %v1007_v11 }
 0x4bd   : > { %v1017_v13 = vmax.f32 %v1009_v45, %v1015_v12 }
 0x4bf   : > { %1019 = vst.msk [vmem:[%s291_s17 + $0x8] sm:$0xff] %vm415_vm1, %v1017_v13 }
 0x4c0 PF: > { %s18_s24 = sadd.s32 1, %s1561_s24  }
 0x4c1   : > { %p15_p4 = scmp.ge.s32.totalorder %s18_s24, 4  }
 0x4c3   :  { %17 = sbr.rel (!%p15_p4) target bundleno = 1 (0x1), region = 92 }

// kernel: forward.5
= control target key start
LH: loop header
LB: loop body
LE: loop exit
PB: predicated region body
PF: predicated region fallthrough
CT: control target
= control target key end

     0   :  { %v1022_v2 = vmov 0.0|0.0   ;;  %vm99_vm0 = vcmask 130048   ;;  %vm1024_vm1 = vmmov 0   ;;  %vm243_vm2 = vcmask 982016   ;;  %s1454_s1 = inlined_call_operand.vmem [shape: f32[400,120], index: 1, kind: input, shape index: {}]   ;;  %s1455_s0 = inlined_call_operand.vmem [shape: f32[8,400], index: 0, kind: input, shape index: {}]   ;;  %s1456_s5 = inlined_call_operand.vmem [shape: f32[120,120], index: 5, kind: input, shape index: {}]   ;;  %s1457_s2 = inlined_call_operand.vmem [shape: f32[1,120], index: 2, kind: input, shape index: {}]   ;;  %s1458_s10 = inlined_call_operand.vmem [shape: f32[8,120], index: 10, kind: output, shape index: {0}]   ;;  %s1459_s6 = inlined_call_operand.vmem [shape: f32[120,84], index: 6, kind: input, shape index: {}]   ;;  %s1460_s8 = inlined_call_operand.vmem [shape: f32[84,10], index: 8, kind: input, shape index: {}]   ;;  %s1461_s3 = inlined_call_operand.vmem [shape: f32[1,120], index: 3, kind: input, shape index: {}]   ;;  %s1462_s4 = inlined_call_operand.vmem [shape: f32[1,120], index: 4, kind: input, shape index: {}]   ;;  %s1463_s7 = inlined_call_operand.vmem [shape: f32[1,84], index: 7, kind: input, shape index: {}]   ;;  %s1464_s11 = inlined_call_operand.vmem [shape: f32[8,84], index: 11, kind: output, shape index: {1}]   ;;  %s1465_s9 = inlined_call_operand.vmem [shape: f32[1,10], index: 9, kind: input, shape index: {}]   ;;  %s1466_s12 = inlined_call_operand.vmem [shape: f32[8,10], index: 12, kind: output, shape index: {2}]  }
   0x1   :  { %v58_v0 = vld [vmem:[%s1454_s1 + $0x80] sm:$0xff]  ;;  %v59_v1 = vld [vmem:[%s1454_s1 + $0x88] sm:$0xff]  ;;  %908 = vmatprep.subr.bf16.mxu1 %v1022_v2  ;;  %v60_v10 = vld [vmem:[%s1454_s1 + $0x90] sm:$0xff]  ;;  %vm546_vm3 = vcmask 1043456   ;;  %vm522_vm4 = vcmask 687104   ;;  %vm620_vm5 = vcmask 80896  }
   0x2   :  { %v42_v3 = vld [vmem:[%s1454_s1] sm:$0xff]  ;;  %v876_v4 = vpack.c.bf16 %v59_v1, %v58_v0  ;;  %v43_v5 = vld [vmem:[%s1454_s1 + $0x8] sm:$0xff]  ;;  %v61_v11 = vld [vmem:[%s1454_s1 + $0x98] sm:$0xff] }
   0x3   :  { %v74_v6 = vld [vmem:[%s1454_s1 + $0x100] sm:$0xff]  ;;  %v75_v7 = vld [vmem:[%s1454_s1 + $0x108] sm:$0xff]  ;;  %v878_v8 = vpack.c.bf16 %v43_v5, %v42_v3  ;;  %v44_v12 = vld [vmem:[%s1454_s1 + $0x10] sm:$0xff]  ;;  %v880_v13 = vpack.c.bf16 %v61_v11, %v60_v10 }
   0x4   :  { %v909_v9 = vpack.c.bf16 %v75_v7, %v74_v6  ;;  %877 = vmatprep.subr.bf16.mxu0 %v876_v4  ;;  %v45_v14 = vld [vmem:[%s1454_s1 + $0x18] sm:$0xff]  ;;  %v76_v15 = vld [vmem:[%s1454_s1 + $0x110] sm:$0xff]  ;;  %v62_v19 = vld [vmem:[%s1454_s1 + $0xa0] sm:$0xff] }
   0x5   :  { %v77_v16 = vld [vmem:[%s1454_s1 + $0x118] sm:$0xff]  ;;  %879 = vmatpush3.bf16.msra.mxu0 %v878_v8  ;;  %v882_v17 = vpack.c.bf16 %v45_v14, %v44_v12  ;;  %v63_v20 = vld [vmem:[%s1454_s1 + $0xa8] sm:$0xff]  ;;  %v46_v21 = vld [vmem:[%s1454_s1 + $0x20] sm:$0xff] }
   0x6   :  { %910 = vmatpush1.bf16.msra.mxu1 %v909_v9  ;;  %v912_v18 = vpack.c.bf16 %v77_v16, %v76_v15  ;;  %881 = vmatprep.subr.bf16.mxu0 %v880_v13  ;;  %v884_v22 = vpack.c.bf16 %v63_v20, %v62_v19  ;;  %v47_v23 = vld [vmem:[%s1454_s1 + $0x28] sm:$0xff]  ;;  %v78_v24 = vld [vmem:[%s1454_s1 + $0x120] sm:$0xff]  ;;  %v64_v26 = vld [vmem:[%s1454_s1 + $0xb0] sm:$0xff] }
   0x7   :  { %911 = vmatprep.subr.bf16.mxu1 %v1022_v2  ;;  %v79_v25 = vld [vmem:[%s1454_s1 + $0x128] sm:$0xff]  ;;  %v65_v27 = vld [vmem:[%s1454_s1 + $0xb8] sm:$0xff]  ;;  %v886_v28 = vpack.c.bf16 %v47_v23, %v46_v21  ;;  %v48_v30 = vld [vmem:[%s1454_s1 + $0x30] sm:$0xff] }
   0x8   :  { %v915_v29 = vpack.c.bf16 %v79_v25, %v78_v24  ;;  %v888_v31 = vpack.c.bf16 %v65_v27, %v64_v26  ;;  %v49_v32 = vld [vmem:[%s1454_s1 + $0x38] sm:$0xff]  ;;  %v80_v33 = vld [vmem:[%s1454_s1 + $0x130] sm:$0xff]  ;;  %v66_v35 = vld [vmem:[%s1454_s1 + $0xc0] sm:$0xff] }
   0x9   :  { %883 = vmatpush3.bf16.msra.mxu0 %v882_v17  ;;  %v81_v34 = vld [vmem:[%s1454_s1 + $0x138] sm:$0xff]  ;;  %v67_v36 = vld [vmem:[%s1454_s1 + $0xc8] sm:$0xff]  ;;  %v890_v37 = vpack.c.bf16 %v49_v32, %v48_v30  ;;  %v50_v39 = vld [vmem:[%s1454_s1 + $0x40] sm:$0xff] }
   0xa   :  { %913 = vmatpush1.bf16.msra.mxu1 %v912_v18  ;;  %885 = vmatprep.subr.bf16.mxu0 %v884_v22  ;;  %v918_v38 = vpack.c.bf16 %v81_v34, %v80_v33  ;;  %v892_v40 = vpack.c.bf16 %v67_v36, %v66_v35  ;;  %v51_v41 = vld [vmem:[%s1454_s1 + $0x48] sm:$0xff]  ;;  %v82_v42 = vld [vmem:[%s1454_s1 + $0x140] sm:$0xff]  ;;  %v68_v44 = vld [vmem:[%s1454_s1 + $0xd0] sm:$0xff] }
   0xb   :  { %914 = vmatprep.subr.bf16.mxu1 %v1022_v2  ;;  %v83_v43 = vld [vmem:[%s1454_s1 + $0x148] sm:$0xff]  ;;  %v69_v45 = vld [vmem:[%s1454_s1 + $0xd8] sm:$0xff]  ;;  %v894_v46 = vpack.c.bf16 %v51_v41, %v50_v39  ;;  %v52_v48 = vld [vmem:[%s1454_s1 + $0x50] sm:$0xff] }
   0xc   :  { %v921_v47 = vpack.c.bf16 %v83_v43, %v82_v42  ;;  %v53_v49 = vld [vmem:[%s1454_s1 + $0x58] sm:$0xff]  ;;  %v39_v50 = vld [vmem:[%s1455_s0 + $0x8] sm:$0xff]  ;;  %v896_v51 = vpack.c.bf16 %v69_v45, %v68_v44  ;;  %v84_v52 = vld [vmem:[%s1454_s1 + $0x150] sm:$0xff] }
   0xd   :  { %887 = vmatpush3.bf16.msra.mxu0 %v886_v28  ;;  %v85_v53 = vld [vmem:[%s1454_s1 + $0x158] sm:$0xff]  ;;  %v70_v55 = vld [vmem:[%s1454_s1 + $0xe0] sm:$0xff]  ;;  %v71_v56 = vld [vmem:[%s1454_s1 + $0xe8] sm:$0xff]  ;;  %167 = vmatprep.mubr.f32.mxu0 %v39_v50  ;;  %v898_v57 = vpack.c.bf16 %v53_v49, %v52_v48 }
   0xe   :  { %916 = vmatpush1.bf16.msra.mxu1 %v915_v29  ;;  %889 = vmatprep.subr.bf16.mxu0 %v888_v31  ;;  %v41_v54 = vld [vmem:[%s1455_s0 + $0x18] sm:$0xff]  ;;  %v924_v58 = vpack.c.bf16 %v85_v53, %v84_v52  ;;  %v54_v59 = vld [vmem:[%s1454_s1 + $0x60] sm:$0xff]  ;;  %v900_v60 = vpack.c.bf16 %v71_v56, %v70_v55  ;;  %v55_v61 = vld [vmem:[%s1454_s1 + $0x68] sm:$0xff] }
   0xf   :  { %917 = vmatprep.subr.bf16.mxu1 %v1022_v2  ;;  %647 = vmatprep.mubr.msk.f32.mxu1 %vm99_vm0, %v41_v54  ;;  %v86_v62 = vld [vmem:[%s1454_s1 + $0x160] sm:$0xff]  ;;  %v87_v63 = vld [vmem:[%s1454_s1 + $0x168] sm:$0xff]  ;;  %v72_v0 = vld [vmem:[%s1454_s1 + $0xf0] sm:$0xff]  ;;  %v902_v3 = vpack.c.bf16 %v55_v61, %v54_v59 }
  0x10   :  { %v73_v1 = vld [vmem:[%s1454_s1 + $0xf8] sm:$0xff]  ;;  %v927_v4 = vpack.c.bf16 %v87_v63, %v86_v62  ;;  %v56_v5 = vld [vmem:[%s1454_s1 + $0x70] sm:$0xff]  ;;  %v90_v12 = vld [vmem:[%s1454_s1 + $0x180] sm:$0xff] }
  0x11   :  { %891 = vmatpush3.bf16.msra.mxu0 %v890_v37  ;;  %v904_v6 = vpack.c.bf16 %v73_v1, %v72_v0  ;;  %v57_v7 = vld [vmem:[%s1454_s1 + $0x78] sm:$0xff]  ;;  %v88_v8 = vld [vmem:[%s1454_s1 + $0x170] sm:$0xff]  ;;  %v91_v13 = vld [vmem:[%s1454_s1 + $0x188] sm:$0xff] }
  0x12   :  { %919 = vmatpush1.bf16.msra.mxu1 %v918_v38  ;;  %893 = vmatprep.subr.bf16.mxu0 %v892_v40  ;;  %v89_v9 = vld [vmem:[%s1454_s1 + $0x178] sm:$0xff]  ;;  %v906_v10 = vpack.c.bf16 %v57_v7, %v56_v5  ;;  %v245_v14 = vld [vmem:[%s1456_s5] sm:$0xff]  ;;  %v246_v15 = vld [vmem:[%s1456_s5 + $0x8] sm:$0xff]  ;;  %v933_v17 = vpack.c.bf16 %v91_v13, %v90_v12  ;;  %v1023_v38 = vmov 0.0  }
  0x13   :  { %920 = vmatprep.subr.bf16.mxu1 %v1022_v2  ;;  %v930_v11 = vpack.c.bf16 %v89_v9, %v88_v8  ;;  %v38_v16 = vld [vmem:[%s1455_s0] sm:$0xff]  ;;  %v936_v18 = vpack.c.bf16 %v246_v15, %v245_v14  ;;  %v247_v19 = vld [vmem:[%s1456_s5 + $0x10] sm:$0xff]  ;;  %v248_v20 = vld [vmem:[%s1456_s5 + $0x18] sm:$0xff] }
  0x14   :  { %v40_v21 = vld [vmem:[%s1455_s0 + $0x10] sm:$0xff]  ;;  %v939_v22 = vpack.c.bf16 %v248_v20, %v247_v19  ;;  %v249_v23 = vld [vmem:[%s1456_s5 + $0x20] sm:$0xff]  ;;  %v250_v24 = vld [vmem:[%s1456_s5 + $0x28] sm:$0xff] }
  0x15   :  { %895 = vmatpush3.bf16.msra.mxu0 %v894_v46  ;;  %v942_v25 = vpack.c.bf16 %v250_v24, %v249_v23  ;;  %v251_v26 = vld [vmem:[%s1456_s5 + $0x30] sm:$0xff]  ;;  %v252_v27 = vld [vmem:[%s1456_s5 + $0x38] sm:$0xff]  ;;  %v253_v29 = vld [vmem:[%s1456_s5 + $0x40] sm:$0xff] }
  0x16   :  { %922 = vmatpush1.bf16.msra.mxu1 %v921_v47  ;;  %897 = vmatprep.subr.bf16.mxu0 %v896_v51  ;;  %v945_v28 = vpack.c.bf16 %v252_v27, %v251_v26  ;;  %v254_v30 = vld [vmem:[%s1456_s5 + $0x48] sm:$0xff]  ;;  %v255_v32 = vld [vmem:[%s1456_s5 + $0x50] sm:$0xff]  ;;  %v256_v33 = vld [vmem:[%s1456_s5 + $0x58] sm:$0xff] }
  0x17   :  { %923 = vmatprep.subr.bf16.mxu1 %v1022_v2  ;;  %v948_v31 = vpack.c.bf16 %v254_v30, %v253_v29  ;;  %v951_v34 = vpack.c.bf16 %v256_v33, %v255_v32  ;;  %v257_v35 = vld [vmem:[%s1456_s5 + $0x60] sm:$0xff]  ;;  %v258_v36 = vld [vmem:[%s1456_s5 + $0x68] sm:$0xff]  ;;  %v259_v39 = vld [vmem:[%s1456_s5 + $0x70] sm:$0xff] }
  0x18   :  { %v954_v37 = vpack.c.bf16 %v258_v36, %v257_v35  ;;  %v646_v42 = vld [vmem:[%s1457_s2] ss:$0 sm:$0xff]  ;;  %v428_v49 = vld [vmem:[%s1459_s6 + $0x8] sm:$0xff]  ;;  %v429_v50 = vld [vmem:[%s1459_s6 + $0x10] sm:$0xff] }
  0x19   :  { %899 = vmatpush3.bf16.msra.mxu0 %v898_v57  ;;  %v427_v48 = vld [vmem:[%s1459_s6] sm:$0xff]  ;;  %v430_v52 = vld [vmem:[%s1459_s6 + $0x18] sm:$0xff]  ;;  %v432_v59 = vld [vmem:[%s1459_s6 + $0x28] sm:$0xff] }
  0x1a   :  { %925 = vmatpush1.bf16.msra.mxu1 %v924_v58  ;;  %901 = vmatprep.subr.bf16.mxu0 %v900_v60  ;;  %v978_v51 = vpack.c.bf16 %v428_v49, %v427_v48  ;;  %v981_v53 = vpack.c.bf16 %v430_v52, %v429_v50  ;;  %v431_v58 = vld [vmem:[%s1459_s6 + $0x20] sm:$0xff]  ;;  %v433_v61 = vld [vmem:[%s1459_s6 + $0x30] sm:$0xff]  ;;  %v434_v62 = vld [vmem:[%s1459_s6 + $0x38] sm:$0xff] }
  0x1b   :  { %926 = vmatprep.subr.bf16.mxu1 %v1022_v2  ;;  %v984_v60 = vpack.c.bf16 %v432_v59, %v431_v58  ;;  %v987_v63 = vpack.c.bf16 %v434_v62, %v433_v61  ;;  %v435_v0 = vld [vmem:[%s1459_s6 + $0x40] sm:$0xff]  ;;  %v436_v1 = vld [vmem:[%s1459_s6 + $0x48] sm:$0xff]  ;;  %v438_v5 = vld [vmem:[%s1459_s6 + $0x58] sm:$0xff] }
  0x1c   :  { %v439_v7 = vld [vmem:[%s1459_s6 + $0x60] sm:$0xff]  ;;  %v440_v8 = vld [vmem:[%s1459_s6 + $0x68] sm:$0xff]  ;;  %v527_v13 = vld [vmem:[%s1460_s8 + $0x10] sm:$0xff] }
  0x1d   :  { %903 = vmatpush3.bf16.msra.mxu0 %v902_v3  ;;  %v990_v3 = vpack.c.bf16 %v436_v1, %v435_v0  ;;  %v996_v9 = vpack.c.bf16 %v440_v8, %v439_v7  ;;  %v526_v12 = vld [vmem:[%s1460_s8 + $0x8] sm:$0xff]  ;;  %v528_v15 = vld [vmem:[%s1460_s8 + $0x18] sm:$0xff]  ;;  %v531_v20 = vld [vmem:[%s1460_s8 + $0x30] sm:$0xff] }
  0x1e   :  { %928 = vmatpush1.bf16.msra.mxu1 %v927_v4  ;;  %905 = vmatprep.subr.bf16.mxu0 %v904_v6  ;;  %v437_v4 = vld [vmem:[%s1459_s6 + $0x50] sm:$0xff]  ;;  %v650_v27 = vld [vmem:[%s1461_s3] ss:$0 sm:$0xff]  ;;  %v534_v33 = vld [vmem:[%s1460_s8 + $0x48] sm:$0xff] }
  0x1f   :  { %929 = vmatprep.subr.bf16.mxu1 %v1022_v2  ;;  %v993_v6 = vpack.c.bf16 %v438_v5, %v437_v4  ;;  %v651_v29 = vld [vmem:[%s1462_s4] ss:$0 sm:$0xff]  ;;  %v535_v35 = vld [vmem:[%s1460_s8 + $0x50] sm:$0xf] }
  0x20   :  { %v652_v36 = vld [vmem:[%s1463_s7] ss:$0 sm:$0xff] }
  0x21   :  { %907 = vmatpush3.bf16.msra.mxu0 %v906_v10  ;;  %v441_v10 = vld [vmem:[%s1459_s6 + $0x70] sm:$0xff] }
  0x22   :  { %931 = vmatpush1.bf16.msra.mxu1 %v930_v11  ;;  %935 = vmatprep.subr.bf16.mxu0 %v1022_v2  ;;  %v525_v11 = vld [vmem:[%s1460_s8] sm:$0xff] }
  0x23   :  { %932 = vmatprep.subr.bf16.mxu1 %v1022_v2  ;;  %v999_v14 = vpack.c.bf16 %v526_v12, %v525_v11 }
  0x24   :  { %168 = vmatmul.mubr.f32.vlgmr.msra.gmra.mrb[0].mxu0 %v38_v16  ;;  %v1002_v16 = vpack.c.bf16 %v528_v15, %v527_v13 }
  0x25   :  { %937 = vmatpush3.bf16.msra.mxu0 %v936_v18  ;;  %782 = vmatprep.mubr.msk.f32.mxu0 %vm1024_vm1, %v1023_v38 }
  0x26   :  { %934 = vmatpush1.bf16.msra.mxu1 %v933_v17  ;;  %938 = vmatprep.subr.bf16.mxu0 %v1022_v2  ;;  %v529_v17 = vld [vmem:[%s1460_s8 + $0x20] sm:$0xff] }
  0x27   :  { %956 = vmatprep.subr.bf16.mxu1 %v1022_v2 }
  0x29   :  { %238 = vmatmul.mubr.f32.vlgmr.msra.gmra.mrb[0].mxu1 %v40_v21  ;;  %940 = vmatpush3.bf16.msra.mxu0 %v939_v22  ;;  %v532_v21 = vld [vmem:[%s1460_s8 + $0x38] sm:$0xff] }
  0x2a   :  { %958 = vmatpush3.bf16.msra.mxu1 %v936_v18  ;;  %941 = vmatprep.subr.bf16.mxu0 %v1022_v2  ;;  %v530_v18 = vld [vmem:[%s1460_s8 + $0x28] sm:$0xff] }
  0x2b   :  { %959 = vmatprep.subr.bf16.mxu1 %v1022_v2  ;;  %815 = vmatprep.mubr.msk.f32.mxu1 %vm1024_vm1, %v1023_v38  ;;  %v1005_v19 = vpack.c.bf16 %v530_v18, %v529_v17 }
  0x2d   :  { %943 = vmatpush3.bf16.msra.mxu0 %v942_v25 }
  0x2e   :  { %961 = vmatpush3.bf16.msra.mxu1 %v939_v22  ;;  %944 = vmatprep.subr.bf16.mxu0 %v1022_v2  ;;  %v1008_v22 = vpack.c.bf16 %v532_v21, %v531_v20 }
  0x2f   :  { %962 = vmatprep.subr.bf16.mxu1 %v1022_v2 }
  0x31   :  { %946 = vmatpush3.bf16.msra.mxu0 %v945_v28 }
  0x32   :  { %964 = vmatpush3.bf16.msra.mxu1 %v942_v25  ;;  %947 = vmatprep.subr.bf16.mxu0 %v1022_v2 }
  0x33   :  { %965 = vmatprep.subr.bf16.mxu1 %v1022_v2 }
  0x35   :  { %949 = vmatpush3.bf16.msra.mxu0 %v948_v31 }
  0x36   :  { %967 = vmatpush3.bf16.msra.mxu1 %v945_v28  ;;  %950 = vmatprep.subr.bf16.mxu0 %v1022_v2 }
  0x37   :  { %968 = vmatprep.subr.bf16.mxu1 %v1022_v2 }
  0x39   :  { %952 = vmatpush3.bf16.msra.mxu0 %v951_v34 }
  0x3a   :  { %970 = vmatpush3.bf16.msra.mxu1 %v948_v31  ;;  %953 = vmatprep.subr.bf16.mxu0 %v1022_v2 }
  0x3b   :  { %971 = vmatprep.subr.bf16.mxu1 %v1022_v2 }
  0x3d   :  { %955 = vmatpush3.bf16.msra.mxu0 %v954_v37 }
  0x3e   :  { %973 = vmatpush3.bf16.msra.mxu1 %v951_v34  ;;  %780 = vmatprep.subr.mxu0 %v1023_v38 }
  0x3f   :  { %974 = vmatprep.subr.bf16.mxu1 %v1022_v2 }
  0x41   :  { %781 = vmatpush3.msra.mxu0 %v259_v39 }
  0x42   :  { %976 = vmatpush3.bf16.msra.mxu1 %v954_v37  ;;  %977 = vmatprep.subr.bf16.mxu0 %v1022_v2 }
  0x43   :  { %813 = vmatprep.subr.mxu1 %v1023_v38 }
  0x46   :  { %814 = vmatpush3.msra.mxu1 %v259_v39 }
  0x47   :  { %998 = vmatprep.subr.bf16.mxu1 %v1022_v2 }
  0xf7   :  { %v689_v40 = vpop.f32.mrb[0].mxu0 }
  0xf8   :  { %v690_v41 = vpop.f32.mrb[1].mxu0 }
  0xf9   :  { %v691_v43 = vadd.f32 %v690_v41, %v689_v40 }
  0xfb   :  { %v170_v44 = vadd.f32 %v691_v43, %v646_v42 }
  0xfc   :  { %v239_v45 = vpop.f32.mrb[0].mxu1 }
  0xfd   :  { %v241_v46 = vpop.f32.mrb[1].mxu1  ;;  %v240_v47 = vadd.f32 %v239_v45, %v170_v44 }
  0xff   :  { %244 = vst.msk [vmem:[%s1458_s10] sm:$0xff] %vm243_vm2, %v240_v47  ;;  %783 = vmatmul.mubr.msk.f32.vlgmr.msra.gmra.mrb[2].mxu0 %vm243_vm2, %v240_v47 }
 0x100   :  { %848 = vmatprep.mubr.msk.f32.mxu0 %vm1024_vm1, %v1023_v38  ;;  %979 = vmatpush3.bf16.msra.mxu0 %v978_v51 }
 0x101   :  { %980 = vmatprep.subr.bf16.mxu0 %v1022_v2 }
 0x104   :  { %982 = vmatpush3.bf16.msra.mxu0 %v981_v53 }
 0x105   :  { %983 = vmatprep.subr.bf16.mxu0 %v1022_v2 }
 0x108   :  { %985 = vmatpush3.bf16.msra.mxu0 %v984_v60 }
 0x109   :  { %986 = vmatprep.subr.bf16.mxu0 %v1022_v2 }
 0x10c   :  { %988 = vmatpush3.bf16.msra.mxu0 %v987_v63 }
 0x10d   :  { %989 = vmatprep.subr.bf16.mxu0 %v1022_v2 }
 0x110   :  { %991 = vmatpush3.bf16.msra.mxu0 %v990_v3 }
 0x111   :  { %992 = vmatprep.subr.bf16.mxu0 %v1022_v2 }
 0x114   :  { %994 = vmatpush3.bf16.msra.mxu0 %v993_v6 }
 0x115   :  { %995 = vmatprep.subr.bf16.mxu0 %v1022_v2 }
 0x118   :  { %997 = vmatpush3.bf16.msra.mxu0 %v996_v9 }
 0x119   :  { %846 = vmatprep.subr.mxu0 %v1023_v38 }
 0x11c   :  { %847 = vmatpush3.msra.mxu0 %v441_v10 }
 0x1d2   :  { %v329_v54 = vpop.f32.mrb[2].mxu0 }
 0x1d3   :  { %v333_v55 = vsub.f32 %v240_v47, %v329_v54  ;;  %v784_v56 = vpop.f32.mrb[3].mxu0 }
 0x1d5   :  { %v334_v57 = vmul.f32 %v333_v55, %v333_v55 }
 0x1d7   :  { %816 = vmatmul.mubr.msk.f32.vlgmr.msra.gmra.mrb[2].mxu1 %vm243_vm2, %v334_v57 }
 0x1d8   :  { %873 = vmatprep.mubr.msk.f32.mxu1 %vm1024_vm1, %v1023_v38  ;;  %1000 = vmatpush3.bf16.msra.mxu1 %v999_v14 }
 0x1d9   :  { %1001 = vmatprep.subr.bf16.mxu1 %v1022_v2 }
 0x1dc   :  { %1003 = vmatpush3.bf16.msra.mxu1 %v1002_v16 }
 0x1dd   :  { %1004 = vmatprep.subr.bf16.mxu1 %v1022_v2 }
 0x1e0   :  { %1006 = vmatpush3.bf16.msra.mxu1 %v1005_v19 }
 0x1e1   :  { %1007 = vmatprep.subr.bf16.mxu1 %v1022_v2 }
 0x1e4   :  { %1009 = vmatpush3.bf16.msra.mxu1 %v1008_v22 }
 0x1e5   :  { %1010 = vmatprep.subr.bf16.mxu1 %v1022_v2  ;;  %v533_v2 = vld [vmem:[%s1460_s8 + $0x40] sm:$0xff] }
 0x1e6   :  { %v1011_v34 = vpack.c.bf16 %v534_v33, %v533_v2 }
 0x1e8   :  { %1012 = vmatpush3.bf16.msra.mxu1 %v1011_v34 }
 0x1e9   :  { %871 = vmatprep.subr.mxu1 %v1023_v38  ;;  %v654_v38 = vld [vmem:[%s1465_s9] ss:$0 sm:$0xff] }
 0x1ec   :  { %872 = vmatpush3.msk.msra.mxu1 %vm546_vm3, %v535_v35 }
 0x2aa   :  { %v404_v23 = vpop.f32.mrb[2].mxu1 }
 0x2ab   :  { %v405_v24 = vadd.f32 1e-05, %v404_v23  ;;  %v817_v25 = vpop.f32.mrb[3].mxu1 }
 0x2ad   :  { %1016 = vrsqrt.f32 %v405_v24 }
 0x2b7   :  { %v1017_v26 = vpop.eup %1016 }
 0x2b8   :  { %v409_v28 = vmul.f32 %v1017_v26, %v333_v55 }
 0x2ba   :  { %v417_v30 = vmul.f32 %v650_v27, %v409_v28 }
 0x2bc   :  { %v425_v31 = vadd.f32 %v651_v29, %v417_v30 }
 0x2be   :  { %v426_v32 = vmax.f32 %v425_v31, 0.0 }
 0x2c0   :  { %849 = vmatmul.mubr.msk.f32.vlgmr.msra.gmra.mrb[4].mxu0 %vm243_vm2, %v426_v32 }
 0x393   :  { %v518_v37 = vpop.f32.mrb[4].mxu0 }
 0x394   :  { %v519_v39 = vadd.f32 %v652_v36, %v518_v37  ;;  %v850_v40 = vpop.f32.mrb[5].mxu0 }
 0x396   :  { %523 = vst.msk [vmem:[%s1464_s11] sm:$0xff] %vm522_vm4, %v519_v39  ;;  %v524_v41 = vmax.f32 %v519_v39, 0.0 }
 0x398   :  { %874 = vmatmul.mubr.msk.f32.vlgmr.msra.gmra.mrb[4].mxu1 %vm522_vm4, %v524_v41 }
 0x46b   :  { %v616_v42 = vpop.f32.mrb[4].mxu1 }
 0x46c   :  { %v617_v43 = vadd.f32 %v654_v38, %v616_v42  ;;  %v875_v44 = vpop.f32.mrb[5].mxu1 }
 0x46e   :  { %v621_v45 = vsel %vm620_vm5, %v617_v43, -inf }
 0x46f   :  { %622 = vmax.xlane.f32.xlu0 %v621_v45 }
 0x4fc   :  { %v623_v46 = vpop.xlane.xlu0 %622 }
 0x4fd   :  { %v624_v47 = vsub.f32 %v617_v43, %v623_v46 }
 0x4ff   :  { %v625_v48 = vmul.f32 1.442695, %v624_v47 }
 0x501   :  { %1018 = vpow2.f32 %v625_v48 }
 0x50b   :  { %v1019_v49 = vpop.eup %1018 }
 0x50c   :  { %v627_v50 = vsel %vm620_vm5, %v1019_v49, 0.0 }
 0x50d   :  { %628 = vadd.xlane.f32.xlu0 %v627_v50 }
 0x59a   :  { %v629_v51 = vpop.xlane.xlu0 %628 }
 0x59b   :  { %1020 = vlog2.f32 %v629_v51 }
 0x5a5   :  { %v1021_v52 = vpop.eup %1020 }
 0x5a6   :  { %v631_v53 = vmul.f32 0.6931472, %v1021_v52 }
 0x5a8   :  { %v632_v54 = vsub.f32 %v624_v47, %v631_v53 }
 0x5aa   :  { %633 = vst.msk [vmem:[%s1466_s12] sm:$0xff] %vm620_vm5, %v632_v54 }

</bundles_post_ra>
